<compile_context>
chip_gen: v5e
topology: v5e:2x2
jax: 0.10.0
libtpu: 0.0.40
codegen_flags: <defaults>
</compile_context>

<pallas_src>
import jax
import jax.numpy as jnp
from jax.experimental import pallas as pl
from jax.experimental.pallas import tpu as pltpu

NEG_SLOPE = 0.1
LANE = 128
SUBLANE = 8


def _leaky(v):
    return jnp.where(v >= 0, v, NEG_SLOPE * v)


def _round_up(x, m):
    return (x + m - 1) // m * m


def pack_resblock_params(params, K, C):
    """One-time parameter packing (hoisted out of the forward path).

    params: list of (w1 (C,C,K), b1 (C,), w2 (C,C,K), b2 (C,)) in torch layout.
    Returns (w1_all, b1_all, w2_all, b2_all, Cp) where
      w*_all: (U, K*Cp, Cp) bf16  -- tap-folded, channel-padded, MXU ready
      b*_all: (U, 1, Cp)    f32
    """
    Cp = max(LANE, _round_up(C, LANE))

    def pack_w(w):
        wk = jnp.transpose(w, (2, 1, 0))                      # (K, Cin, Cout)
        wp = jnp.zeros((K, Cp, Cp), jnp.float32).at[:, :C, :C].set(wk)
        return wp.reshape(K * Cp, Cp).astype(jnp.bfloat16)

    def pack_b(b):
        return jnp.zeros((1, Cp), jnp.float32).at[0, :C].set(b)

    w1s, b1s, w2s, b2s = [], [], [], []
    for (w1, b1, w2, b2) in params:
        w1s.append(pack_w(w1))
        b1s.append(pack_b(b1))
        w2s.append(pack_w(w2))
        b2s.append(pack_b(b2))
    return (jnp.stack(w1s), jnp.stack(b1s), jnp.stack(w2s), jnp.stack(b2s), Cp)


def _make_resblock_kernel(K, dilations, T_valid, tt, halo, Cp, fold_taps):
    n_units = len(dilations)
    p2 = (K - 1) // 2

    def kernel(xl_ref, xc_ref, xr_ref, w1_ref, b1_ref, w2_ref, b2_ref, o_ref):
        it = pl.program_id(0)                  # time-tile index (leading grid axis)
        # Halo'd tile: [left halo | tile | right halo]  (f32, (tt+2*halo, Cp)).
        xw = jnp.concatenate([xl_ref[0], xc_ref[0], xr_ref[0]], axis=0)
        cur = halo                             # current half-width of valid halo
        for u, d in enumerate(dilations):
            p1 = d * (K - 1) // 2
            L_in = tt + 2 * cur

            # ---- conv #1 (dilated) on the MXU, f32 accumulation
            a1 = _leaky(xw).astype(jnp.bfloat16)
            L1 = L_in - 2 * p1
            w1u = w1_ref[u]
            if fold_taps:
                slab1 = jnp.concatenate(
                    [a1[k * d:k * d + L1, :] for k in range(K)], axis=1)
                h = jnp.dot(slab1, w1u, preferred_element_type=jnp.float32)
            else:
                h = jnp.dot(a1[0:L1, :], w1u[0:Cp, :],
                            preferred_element_type=jnp.float32)
                for k in range(1, K):
                    h = h + jnp.dot(a1[k * d:k * d + L1, :],
                                    w1u[k * Cp:(k + 1) * Cp, :],
                                    preferred_element_type=jnp.float32)
            h = h + b1_ref[u]

            # PyTorch zero-pads h at the true sequence boundary before conv #2:
            # zero every h row whose absolute position lies outside [0, T).
            # (LeakyReLU(0) == 0, so masking h is exactly the torch padding.)
            pos_h = it * tt - cur + p1 + jax.lax.broadcasted_iota(
                jnp.int32, (L1, 1), 0)
            h = jnp.where((pos_h >= 0) & (pos_h < T_valid), h, 0.0)

            # ---- conv #2 (dilation 1)
            a2 = _leaky(h).astype(jnp.bfloat16)
            L2 = L1 - 2 * p2
            w2u = w2_ref[u]
            if fold_taps:
                slab2 = jnp.concatenate(
                    [a2[k:k + L2, :] for k in range(K)], axis=1)
                y = jnp.dot(slab2, w2u, preferred_element_type=jnp.float32)
            else:
                y = jnp.dot(a2[0:L2, :], w2u[0:Cp, :],
                            preferred_element_type=jnp.float32)
                for k in range(1, K):
                    y = y + jnp.dot(a2[k:k + L2, :],
                                    w2u[k * Cp:(k + 1) * Cp, :],
                                    preferred_element_type=jnp.float32)
            y = y + b2_ref[u]

            # ---- residual on the shrunk window
            r = p1 + p2
            xw = xw[r:r + L2, :] + y
            cur -= r

            if u < n_units - 1:
                # Residual values outside the real sequence must be exactly zero
                # before the next unit's conv #1 consumes them as halo (matches
                # PyTorch zero padding of x for the next unit).
                pos = it * tt - cur + jax.lax.broadcasted_iota(
                    jnp.int32, (L2, 1), 0)
                xw = jnp.where((pos >= 0) & (pos < T_valid), xw, 0.0)

        # cur == halo - total receptive field >= 0; center tt rows are the output.
        o_ref[0] = xw[cur:cur + tt, :].astype(o_ref.dtype)

    return kernel


def _vmem_limit_bytes():
    # Don't request the whole chip's VMEM (v7x only has 64 MiB per TC): ask for
    # ~3/4 of the queried capacity (capped at 96 MiB for v5e/v6e), falling back
    # conservatively if the hardware query is unavailable.
    try:
        cap = int(pltpu.get_tpu_info().vmem_capacity_bytes)
    except Exception:
        cap = 64 * 1024 * 1024
    return max(32 * 1024 * 1024, min(cap * 3 // 4, 96 * 1024 * 1024))


def resblock_forward_ntc(x_btc, packed, K, dilations, t_tile=512, fold_taps=True):
    """Channels-last core: x_btc (B, T, C) -> (B, T, C), all units fused."""
    w1_all, b1_all, w2_all, b2_all, Cp = packed
    B, T, C = x_btc.shape
    U = len(dilations)
    assert C <= Cp

    # Total receptive-field halo of the fused units (per side).
    H = sum((d + 1) * (K - 1) // 2 for d in dilations)
    halo = _round_up(max(H, SUBLANE), SUBLANE)
    tt = _round_up(min(t_tile, _round_up(T, halo)), halo)     # halo | tt, tt % 8 == 0
    n_tiles = -(-T // tt)
    R = tt // halo
    total = (n_tiles + 2) * tt      # left pad = tt (block alignment), right pad >= halo

    x = jnp.pad(x_btc.astype(jnp.float32),
                ((0, 0), (tt, total - tt - T), (0, Cp - C)))

    kernel = _make_resblock_kernel(K, dilations, T, tt, halo, Cp, fold_taps)
    full_w = lambda i, b: (0, 0, 0)
    static = pl.Buffered(1)         # constant index_map -> single resident buffer

    flops = 2 * B * n_tiles * U * 2 * tt * (K * Cp) * Cp
    bytes_accessed = (B * n_tiles * (tt + 2 * halo) * Cp * 4          # x tiles + halos
                      + B * n_tiles * tt * Cp * 4                     # output tiles
                      + 2 * U * K * Cp * Cp * 2 + 2 * U * Cp * 4)     # weights/biases
    cost = pl.CostEstimate(flops=flops, transcendentals=0,
                           bytes_accessed=bytes_accessed)

    out = pl.pallas_call(
        kernel,
        out_shape=jax.ShapeDtypeStruct((B, n_tiles * tt, Cp), jnp.float32),
        grid_spec=pltpu.PrefetchScalarGridSpec(
            num_scalar_prefetch=0,
            # Time tiles lead: >=2-way parallel split even at B==1 (v7x megacore).
            grid=(n_tiles, B),
            in_specs=[
                # left halo, center tile, right halo of the same padded input
                pl.BlockSpec((1, halo, Cp), lambda i, b: (b, (i + 1) * R - 1, 0)),
                pl.BlockSpec((1, tt, Cp), lambda i, b: (b, i + 1, 0)),
                pl.BlockSpec((1, halo, Cp), lambda i, b: (b, (i + 2) * R, 0)),
                pl.BlockSpec((U, K * Cp, Cp), full_w, pipeline_mode=static),  # w1
                pl.BlockSpec((U, 1, Cp), full_w, pipeline_mode=static),       # b1
                pl.BlockSpec((U, K * Cp, Cp), full_w, pipeline_mode=static),  # w2
                pl.BlockSpec((U, 1, Cp), full_w, pipeline_mode=static),       # b2
            ],
            out_specs=pl.BlockSpec((1, tt, Cp), lambda i, b: (b, i, 0)),
        ),
        compiler_params=pltpu.CompilerParams(
            dimension_semantics=("parallel", "parallel"),
            vmem_limit_bytes=_vmem_limit_bytes(),
        ),
        cost_estimate=cost,
    )(x, x, x, w1_all, b1_all, w2_all, b2_all)

    return out[:, :T, :C]


def resblock_forward_pallas(x_nct, packed, K, dilations, t_tile=512, fold_taps=True):
    """x_nct: (B, C, T) PyTorch layout. NCT<->NTC conversion done once here; in a
    full generator keep the channels-last layout across blocks instead."""
    y = resblock_forward_ntc(jnp.transpose(x_nct, (0, 2, 1)), packed, K, dilations,
                             t_tile=t_tile, fold_taps=fold_taps)
    return jnp.transpose(y, (0, 2, 1))


# ---------------- pure-JAX reference (PyTorch NCT semantics) ----------------
# Same numeric regime as the kernel: bf16 matmul operands, f32 accumulation.
def ref_resblock(x_nct, params, K, dilations):
    x = x_nct.astype(jnp.float32)
    for (w1, b1, w2, b2), d in zip(params, dilations):
        p1 = d * (K - 1) // 2
        p2 = (K - 1) // 2
        a = _leaky(x).astype(jnp.bfloat16)
        h = jax.lax.conv_general_dilated(
            a, w1.astype(jnp.bfloat16), window_strides=(1,), padding=[(p1, p1)],
            rhs_dilation=(d,), dimension_numbers=('NCH', 'OIH', 'NCH'),
            preferred_element_type=jnp.float32) + b1[None, :, None]
        a2 = _leaky(h).astype(jnp.bfloat16)
        y = jax.lax.conv_general_dilated(
            a2, w2.astype(jnp.bfloat16), window_strides=(1,), padding=[(p2, p2)],
            rhs_dilation=(1,), dimension_numbers=('NCH', 'OIH', 'NCH'),
            preferred_element_type=jnp.float32) + b2[None, :, None]
        x = x + y
    return x


if __name__ == "__main__":
    key = jax.random.PRNGKey(0)
    B, C, T = 2, 4, 50          # small shapes; T not a multiple of the tile on purpose
    K = 3                       # odd kernel size => "same" length (required for residual)
    dilations = [1, 3]
    t_tile = 16                 # small tile so the test exercises halos, seams, masking

    key, kx = jax.random.split(key)
    x_nct = jax.random.normal(kx, (B, C, T), dtype=jnp.float32)

    # deterministic synthetic parameters (torch layout: weight (Cout, Cin, K), bias (C,))
    params = []
    for _ in dilations:
        key, k1, k2, k3, k4 = jax.random.split(key, 5)
        params.append((0.2 * jax.random.normal(k1, (C, C, K), jnp.float32),
                       0.1 * jax.random.normal(k2, (C,), jnp.float32),
                       0.2 * jax.random.normal(k3, (C, C, K), jnp.float32),
                       0.1 * jax.random.normal(k4, (C,), jnp.float32)))

    packed = pack_resblock_params(params, K, C)   # hoisted out of the forward path
    ref = ref_resblock(x_nct, params, K, dilations)

    # Exercise both compute paths: folded slab (v6e/v7x) and tap-wise matmuls (v5e).
    for fold_taps in (True, False):
        out = resblock_forward_pallas(x_nct, packed, K, dilations,
                                      t_tile=t_tile, fold_taps=fold_taps)
        out = jax.block_until_ready(out)
        assert out.shape == (B, C, T)
        err = jnp.max(jnp.abs(out - ref))
        assert jnp.allclose(out, ref, atol=1e-2, rtol=1e-2), \
            f"fold_taps={fold_taps}: Pallas output != reference (max abs diff {err})"

    print("KERNEL_OK")
</pallas_src>

<mosaic_0001>
module attributes {stable_mosaic.version = 11 : i64} {
  func.func @kernel(%arg0: i32, %arg1: i32, %arg2: memref<1x8x128xf32, #tpu.memory_space<vmem>>, %arg3: memref<1x16x128xf32, #tpu.memory_space<vmem>>, %arg4: memref<1x8x128xf32, #tpu.memory_space<vmem>>, %arg5: memref<2x384x128xbf16, #tpu.memory_space<vmem>>, %arg6: memref<2x1x128xf32, #tpu.memory_space<vmem>>, %arg7: memref<2x384x128xbf16, #tpu.memory_space<vmem>>, %arg8: memref<2x1x128xf32, #tpu.memory_space<vmem>>, %arg9: memref<1x16x128xf32, #tpu.memory_space<vmem>>) attributes {dimension_semantics = [#tpu.dimension_semantics<parallel>, #tpu.dimension_semantics<parallel>], iteration_bounds = array<i64: 4, 2>, scalar_prefetch = 0 : i64, scratch_operands = 0 : i64, tpu.core_type = #tpu.core_type<tc>, window_params = [{transform_indices = @transform_0, window_bounds = array<i64: 1, 8, 128>}, {transform_indices = @transform_1, window_bounds = array<i64: 1, 16, 128>}, {transform_indices = @transform_2, window_bounds = array<i64: 1, 8, 128>}, {pipeline_mode = #tpu.pipeline_mode<synchronous>, transform_indices = @transform_3, window_bounds = array<i64: 2, 384, 128>}, {pipeline_mode = #tpu.pipeline_mode<synchronous>, transform_indices = @transform_4, window_bounds = array<i64: 2, 1, 128>}, {pipeline_mode = #tpu.pipeline_mode<synchronous>, transform_indices = @transform_5, window_bounds = array<i64: 2, 384, 128>}, {pipeline_mode = #tpu.pipeline_mode<synchronous>, transform_indices = @transform_6, window_bounds = array<i64: 2, 1, 128>}, {transform_indices = @transform_7, window_bounds = array<i64: 1, 16, 128>}]} {
    %c0 = arith.constant 0 : index
    %c0_0 = arith.constant 0 : index
    %c0_1 = arith.constant 0 : index
    %0 = vector.load %arg2[%c0, %c0_0, %c0_1] : memref<1x8x128xf32, #tpu.memory_space<vmem>>, vector<1x8x128xf32>
    %1 = vector.shape_cast %0 : vector<1x8x128xf32> to vector<8x128xf32>
    %c0_2 = arith.constant 0 : index
    %c0_3 = arith.constant 0 : index
    %c0_4 = arith.constant 0 : index
    %2 = vector.load %arg3[%c0_2, %c0_3, %c0_4] : memref<1x16x128xf32, #tpu.memory_space<vmem>>, vector<1x16x128xf32>
    %3 = vector.shape_cast %2 : vector<1x16x128xf32> to vector<16x128xf32>
    %c0_5 = arith.constant 0 : index
    %c0_6 = arith.constant 0 : index
    %c0_7 = arith.constant 0 : index
    %4 = vector.load %arg4[%c0_5, %c0_6, %c0_7] : memref<1x8x128xf32, #tpu.memory_space<vmem>>, vector<1x8x128xf32>
    %5 = vector.shape_cast %4 : vector<1x8x128xf32> to vector<8x128xf32>
    %6 = tpu.concatenate %1, %3, %5 in 0 : vector<8x128xf32>, vector<16x128xf32>, vector<8x128xf32> -> vector<32x128xf32>
    %cst = arith.constant 0.000000e+00 : f32
    %7 = vector.broadcast %cst : f32 to vector<32x128xf32>
    %8 = arith.cmpf oge, %6, %7 : vector<32x128xf32>
    %cst_8 = arith.constant 1.000000e-01 : f32
    %9 = vector.broadcast %cst_8 : f32 to vector<32x128xf32>
    %10 = arith.mulf %9, %6 : vector<32x128xf32>
    %11 = arith.select %8, %6, %10 : vector<32x128xi1>, vector<32x128xf32>
    %12 = arith.truncf %11 : vector<32x128xf32> to vector<32x128xbf16>
    %c0_9 = arith.constant 0 : index
    %c0_10 = arith.constant 0 : index
    %c0_11 = arith.constant 0 : index
    %13 = vector.load %arg5[%c0_9, %c0_10, %c0_11] : memref<2x384x128xbf16, #tpu.memory_space<vmem>>, vector<1x384x128xbf16>
    %14 = vector.shape_cast %13 : vector<1x384x128xbf16> to vector<384x128xbf16>
    %15 = vector.extract_strided_slice %12 {offsets = [0, 0], sizes = [30, 128], strides = [1, 1]} : vector<32x128xbf16> to vector<30x128xbf16>
    %16 = vector.extract_strided_slice %12 {offsets = [1, 0], sizes = [30, 128], strides = [1, 1]} : vector<32x128xbf16> to vector<30x128xbf16>
    %17 = vector.extract_strided_slice %12 {offsets = [2, 0], sizes = [30, 128], strides = [1, 1]} : vector<32x128xbf16> to vector<30x128xbf16>
    %18 = tpu.concatenate %15, %16, %17 in 1 : vector<30x128xbf16>, vector<30x128xbf16>, vector<30x128xbf16> -> vector<30x384xbf16>
    %cst_12 = arith.constant dense<0.000000e+00> : vector<30x128xf32>
    %19 = tpu.matmul %18, %14, %cst_12 {dimension_numbers = #tpu.dot_dimension_numbers<[1], [0], [0], [1], [0, 0, 1, 1], [], []>} : vector<30x384xbf16>, vector<384x128xbf16>, vector<30x128xf32> -> vector<30x128xf32>
    %c0_13 = arith.constant 0 : index
    %c0_14 = arith.constant 0 : index
    %c0_15 = arith.constant 0 : index
    %20 = vector.load %arg6[%c0_13, %c0_14, %c0_15] : memref<2x1x128xf32, #tpu.memory_space<vmem>>, vector<1x1x128xf32>
    %21 = vector.shape_cast %20 : vector<1x1x128xf32> to vector<1x128xf32>
    %22 = vector.broadcast %21 : vector<1x128xf32> to vector<30x128xf32>
    %23 = arith.addf %19, %22 : vector<30x128xf32>
    %c16_i32 = arith.constant 16 : i32
    %24 = arith.muli %arg0, %c16_i32 : i32
    %c8_i32 = arith.constant 8 : i32
    %25 = arith.subi %24, %c8_i32 : i32
    %c1_i32 = arith.constant 1 : i32
    %26 = arith.addi %25, %c1_i32 : i32
    %27 = tpu.iota {dimensions = array<i32: 0>} : vector<30x1xi32>
    %28 = vector.broadcast %26 : i32 to vector<30x1xi32>
    %29 = arith.addi %28, %27 : vector<30x1xi32>
    %c0_i32 = arith.constant 0 : i32
    %30 = vector.broadcast %c0_i32 : i32 to vector<30x1xi32>
    %31 = arith.cmpi sge, %29, %30 : vector<30x1xi32>
    %c50_i32 = arith.constant 50 : i32
    %32 = vector.broadcast %c50_i32 : i32 to vector<30x1xi32>
    %33 = arith.cmpi slt, %29, %32 : vector<30x1xi32>
    %34 = arith.andi %31, %33 : vector<30x1xi1>
    %cst_16 = arith.constant 0.000000e+00 : f32
    %35 = vector.shape_cast %34 : vector<30x1xi1> to vector<30x1xi1>
    %36 = vector.broadcast %35 : vector<30x1xi1> to vector<30x128xi1>
    %37 = vector.broadcast %cst_16 : f32 to vector<30x128xf32>
    %38 = arith.select %36, %23, %37 : vector<30x128xi1>, vector<30x128xf32>
    %cst_17 = arith.constant 0.000000e+00 : f32
    %39 = vector.broadcast %cst_17 : f32 to vector<30x128xf32>
    %40 = arith.cmpf oge, %38, %39 : vector<30x128xf32>
    %cst_18 = arith.constant 1.000000e-01 : f32
    %41 = vector.broadcast %cst_18 : f32 to vector<30x128xf32>
    %42 = arith.mulf %41, %38 : vector<30x128xf32>
    %43 = arith.select %40, %38, %42 : vector<30x128xi1>, vector<30x128xf32>
    %44 = arith.truncf %43 : vector<30x128xf32> to vector<30x128xbf16>
    %c0_19 = arith.constant 0 : index
    %c0_20 = arith.constant 0 : index
    %c0_21 = arith.constant 0 : index
    %45 = vector.load %arg7[%c0_19, %c0_20, %c0_21] : memref<2x384x128xbf16, #tpu.memory_space<vmem>>, vector<1x384x128xbf16>
    %46 = vector.shape_cast %45 : vector<1x384x128xbf16> to vector<384x128xbf16>
    %47 = vector.extract_strided_slice %44 {offsets = [0, 0], sizes = [28, 128], strides = [1, 1]} : vector<30x128xbf16> to vector<28x128xbf16>
    %48 = vector.extract_strided_slice %44 {offsets = [1, 0], sizes = [28, 128], strides = [1, 1]} : vector<30x128xbf16> to vector<28x128xbf16>
    %49 = vector.extract_strided_slice %44 {offsets = [2, 0], sizes = [28, 128], strides = [1, 1]} : vector<30x128xbf16> to vector<28x128xbf16>
    %50 = tpu.concatenate %47, %48, %49 in 1 : vector<28x128xbf16>, vector<28x128xbf16>, vector<28x128xbf16> -> vector<28x384xbf16>
    %cst_22 = arith.constant dense<0.000000e+00> : vector<28x128xf32>
    %51 = tpu.matmul %50, %46, %cst_22 {dimension_numbers = #tpu.dot_dimension_numbers<[1], [0], [0], [1], [0, 0, 1, 1], [], []>} : vector<28x384xbf16>, vector<384x128xbf16>, vector<28x128xf32> -> vector<28x128xf32>
    %c0_23 = arith.constant 0 : index
    %c0_24 = arith.constant 0 : index
    %c0_25 = arith.constant 0 : index
    %52 = vector.load %arg8[%c0_23, %c0_24, %c0_25] : memref<2x1x128xf32, #tpu.memory_space<vmem>>, vector<1x1x128xf32>
    %53 = vector.shape_cast %52 : vector<1x1x128xf32> to vector<1x128xf32>
    %54 = vector.broadcast %53 : vector<1x128xf32> to vector<28x128xf32>
    %55 = arith.addf %51, %54 : vector<28x128xf32>
    %56 = vector.extract_strided_slice %6 {offsets = [2, 0], sizes = [28, 128], strides = [1, 1]} : vector<32x128xf32> to vector<28x128xf32>
    %57 = arith.addf %56, %55 : vector<28x128xf32>
    %c16_i32_26 = arith.constant 16 : i32
    %58 = arith.muli %arg0, %c16_i32_26 : i32
    %c6_i32 = arith.constant 6 : i32
    %59 = arith.subi %58, %c6_i32 : i32
    %60 = tpu.iota {dimensions = array<i32: 0>} : vector<28x1xi32>
    %61 = vector.broadcast %59 : i32 to vector<28x1xi32>
    %62 = arith.addi %61, %60 : vector<28x1xi32>
    %c0_i32_27 = arith.constant 0 : i32
    %63 = vector.broadcast %c0_i32_27 : i32 to vector<28x1xi32>
    %64 = arith.cmpi sge, %62, %63 : vector<28x1xi32>
    %c50_i32_28 = arith.constant 50 : i32
    %65 = vector.broadcast %c50_i32_28 : i32 to vector<28x1xi32>
    %66 = arith.cmpi slt, %62, %65 : vector<28x1xi32>
    %67 = arith.andi %64, %66 : vector<28x1xi1>
    %cst_29 = arith.constant 0.000000e+00 : f32
    %68 = vector.shape_cast %67 : vector<28x1xi1> to vector<28x1xi1>
    %69 = vector.broadcast %68 : vector<28x1xi1> to vector<28x128xi1>
    %70 = vector.broadcast %cst_29 : f32 to vector<28x128xf32>
    %71 = arith.select %69, %57, %70 : vector<28x128xi1>, vector<28x128xf32>
    %cst_30 = arith.constant 0.000000e+00 : f32
    %72 = vector.broadcast %cst_30 : f32 to vector<28x128xf32>
    %73 = arith.cmpf oge, %71, %72 : vector<28x128xf32>
    %cst_31 = arith.constant 1.000000e-01 : f32
    %74 = vector.broadcast %cst_31 : f32 to vector<28x128xf32>
    %75 = arith.mulf %74, %71 : vector<28x128xf32>
    %76 = arith.select %73, %71, %75 : vector<28x128xi1>, vector<28x128xf32>
    %77 = arith.truncf %76 : vector<28x128xf32> to vector<28x128xbf16>
    %c1 = arith.constant 1 : index
    %c0_32 = arith.constant 0 : index
    %c0_33 = arith.constant 0 : index
    %78 = vector.load %arg5[%c1, %c0_32, %c0_33] : memref<2x384x128xbf16, #tpu.memory_space<vmem>>, vector<1x384x128xbf16>
    %79 = vector.shape_cast %78 : vector<1x384x128xbf16> to vector<384x128xbf16>
    %80 = vector.extract_strided_slice %77 {offsets = [0, 0], sizes = [22, 128], strides = [1, 1]} : vector<28x128xbf16> to vector<22x128xbf16>
    %81 = vector.extract_strided_slice %77 {offsets = [3, 0], sizes = [22, 128], strides = [1, 1]} : vector<28x128xbf16> to vector<22x128xbf16>
    %82 = vector.extract_strided_slice %77 {offsets = [6, 0], sizes = [22, 128], strides = [1, 1]} : vector<28x128xbf16> to vector<22x128xbf16>
    %83 = tpu.concatenate %80, %81, %82 in 1 : vector<22x128xbf16>, vector<22x128xbf16>, vector<22x128xbf16> -> vector<22x384xbf16>
    %cst_34 = arith.constant dense<0.000000e+00> : vector<22x128xf32>
    %84 = tpu.matmul %83, %79, %cst_34 {dimension_numbers = #tpu.dot_dimension_numbers<[1], [0], [0], [1], [0, 0, 1, 1], [], []>} : vector<22x384xbf16>, vector<384x128xbf16>, vector<22x128xf32> -> vector<22x128xf32>
    %c1_35 = arith.constant 1 : index
    %c0_36 = arith.constant 0 : index
    %c0_37 = arith.constant 0 : index
    %85 = vector.load %arg6[%c1_35, %c0_36, %c0_37] : memref<2x1x128xf32, #tpu.memory_space<vmem>>, vector<1x1x128xf32>
    %86 = vector.shape_cast %85 : vector<1x1x128xf32> to vector<1x128xf32>
    %87 = vector.broadcast %86 : vector<1x128xf32> to vector<22x128xf32>
    %88 = arith.addf %84, %87 : vector<22x128xf32>
    %c16_i32_38 = arith.constant 16 : i32
    %89 = arith.muli %arg0, %c16_i32_38 : i32
    %c6_i32_39 = arith.constant 6 : i32
    %90 = arith.subi %89, %c6_i32_39 : i32
    %c3_i32 = arith.constant 3 : i32
    %91 = arith.addi %90, %c3_i32 : i32
    %92 = tpu.iota {dimensions = array<i32: 0>} : vector<22x1xi32>
    %93 = vector.broadcast %91 : i32 to vector<22x1xi32>
    %94 = arith.addi %93, %92 : vector<22x1xi32>
    %c0_i32_40 = arith.constant 0 : i32
    %95 = vector.broadcast %c0_i32_40 : i32 to vector<22x1xi32>
    %96 = arith.cmpi sge, %94, %95 : vector<22x1xi32>
    %c50_i32_41 = arith.constant 50 : i32
    %97 = vector.broadcast %c50_i32_41 : i32 to vector<22x1xi32>
    %98 = arith.cmpi slt, %94, %97 : vector<22x1xi32>
    %99 = arith.andi %96, %98 : vector<22x1xi1>
    %cst_42 = arith.constant 0.000000e+00 : f32
    %100 = vector.shape_cast %99 : vector<22x1xi1> to vector<22x1xi1>
    %101 = vector.broadcast %100 : vector<22x1xi1> to vector<22x128xi1>
    %102 = vector.broadcast %cst_42 : f32 to vector<22x128xf32>
    %103 = arith.select %101, %88, %102 : vector<22x128xi1>, vector<22x128xf32>
    %cst_43 = arith.constant 0.000000e+00 : f32
    %104 = vector.broadcast %cst_43 : f32 to vector<22x128xf32>
    %105 = arith.cmpf oge, %103, %104 : vector<22x128xf32>
    %cst_44 = arith.constant 1.000000e-01 : f32
    %106 = vector.broadcast %cst_44 : f32 to vector<22x128xf32>
    %107 = arith.mulf %106, %103 : vector<22x128xf32>
    %108 = arith.select %105, %103, %107 : vector<22x128xi1>, vector<22x128xf32>
    %109 = arith.truncf %108 : vector<22x128xf32> to vector<22x128xbf16>
    %c1_45 = arith.constant 1 : index
    %c0_46 = arith.constant 0 : index
    %c0_47 = arith.constant 0 : index
    %110 = vector.load %arg7[%c1_45, %c0_46, %c0_47] : memref<2x384x128xbf16, #tpu.memory_space<vmem>>, vector<1x384x128xbf16>
    %111 = vector.shape_cast %110 : vector<1x384x128xbf16> to vector<384x128xbf16>
    %112 = vector.extract_strided_slice %109 {offsets = [0, 0], sizes = [20, 128], strides = [1, 1]} : vector<22x128xbf16> to vector<20x128xbf16>
    %113 = vector.extract_strided_slice %109 {offsets = [1, 0], sizes = [20, 128], strides = [1, 1]} : vector<22x128xbf16> to vector<20x128xbf16>
    %114 = vector.extract_strided_slice %109 {offsets = [2, 0], sizes = [20, 128], strides = [1, 1]} : vector<22x128xbf16> to vector<20x128xbf16>
    %115 = tpu.concatenate %112, %113, %114 in 1 : vector<20x128xbf16>, vector<20x128xbf16>, vector<20x128xbf16> -> vector<20x384xbf16>
    %cst_48 = arith.constant dense<0.000000e+00> : vector<20x128xf32>
    %116 = tpu.matmul %115, %111, %cst_48 {dimension_numbers = #tpu.dot_dimension_numbers<[1], [0], [0], [1], [0, 0, 1, 1], [], []>} : vector<20x384xbf16>, vector<384x128xbf16>, vector<20x128xf32> -> vector<20x128xf32>
    %c1_49 = arith.constant 1 : index
    %c0_50 = arith.constant 0 : index
    %c0_51 = arith.constant 0 : index
    %117 = vector.load %arg8[%c1_49, %c0_50, %c0_51] : memref<2x1x128xf32, #tpu.memory_space<vmem>>, vector<1x1x128xf32>
    %118 = vector.shape_cast %117 : vector<1x1x128xf32> to vector<1x128xf32>
    %119 = vector.broadcast %118 : vector<1x128xf32> to vector<20x128xf32>
    %120 = arith.addf %116, %119 : vector<20x128xf32>
    %121 = vector.extract_strided_slice %71 {offsets = [4, 0], sizes = [20, 128], strides = [1, 1]} : vector<28x128xf32> to vector<20x128xf32>
    %122 = arith.addf %121, %120 : vector<20x128xf32>
    %123 = vector.extract_strided_slice %122 {offsets = [2, 0], sizes = [16, 128], strides = [1, 1]} : vector<20x128xf32> to vector<16x128xf32>
    %c0_52 = arith.constant 0 : index
    %c0_53 = arith.constant 0 : index
    %c0_54 = arith.constant 0 : index
    %124 = vector.load %arg9[%c0_52, %c0_53, %c0_54] : memref<1x16x128xf32, #tpu.memory_space<vmem>>, vector<1x16x128xf32>
    %125 = vector.shape_cast %124 : vector<1x16x128xf32> to vector<16x128xf32>
    %126 = vector.shape_cast %123 : vector<16x128xf32> to vector<1x16x128xf32>
    tpu.vector_store %arg9[%c0_52, %c0_53, %c0_54], %126 {strides = array<i32>} : memref<1x16x128xf32, #tpu.memory_space<vmem>>, vector<1x16x128xf32>,
    return
  }
  func.func @transform_0(%arg0: i32, %arg1: i32) -> (i32, i32, i32) {
    %c1_i32 = arith.constant 1 : i32
    %0 = arith.addi %arg0, %c1_i32 : i32
    %c2_i32 = arith.constant 2 : i32
    %1 = arith.muli %0, %c2_i32 : i32
    %c1_i32_0 = arith.constant 1 : i32
    %2 = arith.subi %1, %c1_i32_0 : i32
    %c0_i32 = arith.constant 0 : i32
    %c0_i32_1 = arith.constant 0 : i32
    return %arg1, %2, %c0_i32 : i32, i32, i32
  }
  func.func @transform_1(%arg0: i32, %arg1: i32) -> (i32, i32, i32) {
    %c1_i32 = arith.constant 1 : i32
    %0 = arith.addi %arg0, %c1_i32 : i32
    %c0_i32 = arith.constant 0 : i32
    %c0_i32_0 = arith.constant 0 : i32
    return %arg1, %0, %c0_i32 : i32, i32, i32
  }
  func.func @transform_2(%arg0: i32, %arg1: i32) -> (i32, i32, i32) {
    %c2_i32 = arith.constant 2 : i32
    %0 = arith.addi %arg0, %c2_i32 : i32
    %c2_i32_0 = arith.constant 2 : i32
    %1 = arith.muli %0, %c2_i32_0 : i32
    %c0_i32 = arith.constant 0 : i32
    %c0_i32_1 = arith.constant 0 : i32
    return %arg1, %1, %c0_i32 : i32, i32, i32
  }
  func.func @transform_3(%arg0: i32, %arg1: i32) -> (i32, i32, i32) {
    %c0_i32 = arith.constant 0 : i32
    %c0_i32_0 = arith.constant 0 : i32
    %c0_i32_1 = arith.constant 0 : i32
    %c0_i32_2 = arith.constant 0 : i32
    return %c0_i32, %c0_i32_0, %c0_i32_1 : i32, i32, i32
  }
  func.func @transform_4(%arg0: i32, %arg1: i32) -> (i32, i32, i32) {
    %c0_i32 = arith.constant 0 : i32
    %c0_i32_0 = arith.constant 0 : i32
    %c0_i32_1 = arith.constant 0 : i32
    %c0_i32_2 = arith.constant 0 : i32
    return %c0_i32, %c0_i32_0, %c0_i32_1 : i32, i32, i32
  }
  func.func @transform_5(%arg0: i32, %arg1: i32) -> (i32, i32, i32) {
    %c0_i32 = arith.constant 0 : i32
    %c0_i32_0 = arith.constant 0 : i32
    %c0_i32_1 = arith.constant 0 : i32
    %c0_i32_2 = arith.constant 0 : i32
    return %c0_i32, %c0_i32_0, %c0_i32_1 : i32, i32, i32
  }
  func.func @transform_6(%arg0: i32, %arg1: i32) -> (i32, i32, i32) {
    %c0_i32 = arith.constant 0 : i32
    %c0_i32_0 = arith.constant 0 : i32
    %c0_i32_1 = arith.constant 0 : i32
    %c0_i32_2 = arith.constant 0 : i32
    return %c0_i32, %c0_i32_0, %c0_i32_1 : i32, i32, i32
  }
  func.func @transform_7(%arg0: i32, %arg1: i32) -> (i32, i32, i32) {
    %c0_i32 = arith.constant 0 : i32
    %c0_i32_0 = arith.constant 0 : i32
    return %arg1, %arg0, %c0_i32 : i32, i32, i32
  }
}

</mosaic_0001>

<bundles_post_ra>
// kernel: tpu_custom_call.1
= control target key start
LH: loop header
LB: loop body
LE: loop exit
PB: predicated region body
PF: predicated region fallthrough
CT: control target
= control target key end

     0   :  { %s3596_s0 = inlined_call_operand.hbm [shape: f32[2,96,128], index: 0, kind: input, shape index: {}]   ;;  %s3597_s1 = inlined_call_operand.hbm [shape: f32[2,96,128], index: 1, kind: input, shape index: {}]   ;;  %s3598_s2 = inlined_call_operand.hbm [shape: f32[2,96,128], index: 2, kind: input, shape index: {}]   ;;  %s3599_s3 = inlined_call_operand.hbm [shape: bf16[2,384,128], index: 3, kind: input, shape index: {}]   ;;  %s3600_s4 = inlined_call_operand.vmem [shape: f32[2,1,128], index: 4, kind: input, shape index: {}]   ;;  %s3601_s5 = inlined_call_operand.hbm [shape: bf16[2,384,128], index: 5, kind: input, shape index: {}]   ;;  %s3602_s6 = inlined_call_operand.vmem [shape: f32[2,1,128], index: 6, kind: input, shape index: {}]   ;;  %s3603_s7 = inlined_call_operand.hbm [shape: f32[2,64,128], index: 7, kind: output, shape index: {}]  }
   0x1   :  { %3626 = sst [smem:[#allocation32_spill]] %s3596_s0 }
   0x2   :  { %3627 = sst [smem:[#allocation33_spill]] %s3597_s1 }
   0x3   :  { %3628 = sst [smem:[#allocation34_spill]] %s3598_s2 }
   0x4   :  { %3629 = sst [smem:[#allocation35_spill]] %s3599_s3 }
   0x5   :  { %3630 = sst [smem:[#allocation36_spill]] %s3600_s4 }
   0x6   :  { %3631 = sst [smem:[#allocation37_spill]] %s3601_s5 }
   0x7   :  { %3632 = sst [smem:[#allocation38_spill]] %s3602_s6 }
   0x8   :  { %3633 = sst [smem:[#allocation39_spill]] %s3603_s7 }
   0x9   :  { %12 = vsyncpa [#allocation3], 0 }
   0xa   :  { %14 = vsyncpa [#allocation3 + $0x1], 0 }
   0xb   :  { %15 = vsyncpa [#allocation6], 0 }
   0xc   :  { %17 = vsyncpa [#allocation6 + $0x1], 0 }
   0xd   :  { %18 = vsyncpa [#allocation9], 0 }
   0xe   :  { %19 = vsyncpa [#allocation4], 0 }
   0xf   :  { %21 = vsyncpa [#allocation4 + $0x1], 0  ;;  %s3097_s24 = smov 0   ;;  %s3099_s25 = smov 0  }
  0x10   :  { %s3101_s26 = smov 0   ;;  %s3103_s27 = smov 0  }
  0x11   :  { %s3105_s28 = smov 0   ;;  %s3107_s29 = smov 0  }
  0x12   :  { %s3109_s30 = smov 0   ;;  %s3111_s8 = smov 0  }
  0x13   :  { %s3113_s9 = smov 0   ;;  %s3115_s10 = smov 0  }
  0x14   :  { %s3117_s11 = smov 0   ;;  %s3119_s12 = smov 0  }
  0x15   :  { %s3121_s13 = smov 0   ;;  %s3123_s14 = smov 0  }
  0x16   :  { %s3125_s15 = smov 0   ;;  %s3127_s16 = smov 0  }
  0x17   :  { %s3129_s17 = smov 0  }
  0x18 LB: > { %3634 = sst [smem:[#allocation17_spill]] %s2995_s27  ;;  %s3183_s18 = sadd.s32 4294967295, %s3047_s17   ;;  %s3047_s17 = sphi %s3129_s17, %s27_s17   ;;  %s3043_s16 = sphi %s3127_s16, %s3693_s16   ;;  %s3039_s15 = sphi %s3125_s15, %s3692_s15   ;;  %s3035_s14 = sphi %s3123_s14, %s3691_s14   ;;  %s3031_s13 = sphi %s3121_s13, %s3690_s13   ;;  %s3027_s12 = sphi %s3119_s12, %s3703_s12   ;;  %s3023_s11 = sphi %s3117_s11, %s3702_s11   ;;  %s3019_s10 = sphi %s3115_s10, %s3688_s10   ;;  %s3015_s9 = sphi %s3113_s9, %s3701_s9   ;;  %s3011_s8 = sphi %s3111_s8, %s3700_s8   ;;  %s3007_s30 = sphi %s3109_s30, %s3687_s30   ;;  %s3003_s29 = sphi %s3107_s29, %s3699_s29   ;;  %s2999_s28 = sphi %s3105_s28, %s3698_s28   ;;  %s2995_s27 = sphi %s3103_s27, %s3697_s27   ;;  %s2991_s26 = sphi %s3101_s26, %s3696_s26   ;;  %s2987_s25 = sphi %s3099_s25, %s3695_s25   ;;  %s2983_s24 = sphi %s3097_s24, %s3694_s24  }
  0x19   : > { %3635 = sst [smem:[#allocation18_spill]] %s3011_s8  ;;  %p2002_p0 = scmp.ge.s32.totalorder %s3047_s17, 1 }
  0x1a   : > { %3636 = sst [smem:[#allocation19_spill]] %s3023_s11  ;;  %p3622_p1 = scmp.eq.s32.totalorder %s3183_s18, 0 }
  0x1b   : > { %3637 = sst [smem:[#allocation20_spill]] %s3031_s13  ;;  %p239_p2 = scmp.eq.s32.totalorder %s3183_s18, 7 }
  0x1c   : > { %3638 = sst [smem:[#allocation21_spill]] %s3035_s14  ;;  %p252_p3 = scmp.lt.s32.totalorder %s3047_s17, 9 }
  0x1d   : > { %3639 = sst [smem:[#allocation22_spill]] %s3039_s15  ;;  %s3049_s23 = smov [#allocation8]  }
  0x1e   : > { %3640 = sst [smem:[#allocation23_spill]] %s3043_s16  ;;  %p3192_p4 = pnand %p2002_p0, %p252_p3 }
  0x1f   : > { %s3641_s3 = sld [smem:[#allocation35_spill]]  ;;  %s265_s7 = sshll.u32 %s3049_s23, 4  ;;  %s266_s7 = int_to_ptr.vmem [resolvable:$true] %s265_s7 }
  0x20   : > { %s3642_s22 = scalar_select %p3192_p4, 1, 0 }
  0x21   : > { %p2540_p5 = pneg %p3192_p4  ;;  %s3608_s20 = smov 64  }
  0x22   : > { %3643 = sst [smem:[#allocation24_spill]] %s3642_s22  ;;  %s3210_s23 = sshll.u32 %s3043_s16, 1 }
  0x23   : > { %p3200_p6 = pnand %p2540_p5, %p3622_p1  ;;  %p62_p7 = scmp.eq.s32.totalorder %s3047_s17, 0 }
  0x24   : > { %p91_p8 = scmp.ne.s32.totalorder %s3015_s9, %s3011_s8  ;;  %p97_p9 = scmp.ne.s32.totalorder %s3011_s8, %s3007_s30 }
  0x25   : > { %s263_s21 = sshll.u32 %s3641_s3, 4  ;;  %s3609_s3 = smov 4   ;;  %s264_s21 = int_to_ptr.hbm [resolvable:$true] %s263_s21 }
  0x26   : > { %2543 = dma.hbm_to_vmem [thread:$0]  (!%p3200_p6), %s264_s21, 6144, %s266_s7, [#allocation9], %s3608_s20, %s3608_s20, %s3609_s3  }
  0x27   : > { %p2563_p10 = scmp.lt.s32.totalorder %s3047_s17, 8  ;;  %p3221_p11 = por %p91_p8, %p62_p7 }
  0x28   : > { %s3612_s4 = smul.u32 12, %s3039_s15  ;;  %p3228_p12 = por %p97_p9, %p3622_p1 }
  0x29   : > { %s323_s7 = sand.u32 1, %s3047_s17   ;;  %s325_s21 = sand.u32 1, %s3015_s9  }
  0x2a   : > { %s3646_s14 = scalar_select %p3228_p12, 1, 0 }
  0x2b   : > { %s2010_s20 = sshll.u32 %s325_s21, 4  ;;  %s3237_s13 = sadd.s32 %s3612_s4, %s3210_s23 }
  0x2c   : > { %3647 = sst [smem:[#allocation25_spill]] %s3646_s14  ;;  %s3613_s30 = sshll.u32 %s3237_s13, 3 }
  0x2d   : > { %3648 = sst [smem:[#allocation26_spill]] %s3237_s13  ;;  %s327_s2 = scalar_lea.vmem [#allocation5], %s2010_s20 }
  0x2e   : > { %s3649_s1 = sld [smem:[#allocation33_spill]]  ;;  %s338_s0 = sshll.u32 %s327_s2, 4  ;;  %s339_s0 = int_to_ptr.vmem [resolvable:$true] %s338_s0 }
  0x2f   : > { %p2551_p13 = pnand %p2563_p10, %p3221_p11  ;;  %s3249_s4 = scalar_lea.sflag [#allocation6], %s323_s7 }
  0x30   : > { %3650 = sst [smem:[#allocation27_spill]] %s3249_s4  ;;  %s3052_s3 = smov 128  }
  0x31   : > { %s3053_s8 = smov 8   ;;  %s3651_s5 = sld [smem:[#allocation37_spill]] }
  0x32   : > { %s3054_s6 = smov [#allocation10]   ;;  %s3652_s7 = smov 4  }
  0x33   : > { %s54_s20 = sadd.s32 1, %s3027_s12  ;;  %p61_p3 = scmp.ne.s32.totalorder %s3027_s12, %s3023_s11 }
  0x34   : > { %s1880_s22 = scalar_lea.hbm %s3649_s1, %s3613_s30  ;;  %s3653_s30 = smov 64  }
  0x35   : > { %s1881_s27 = scalar_lea.hbm %s1880_s22, 16  ;;  %p67_p8 = scmp.ne.s32.totalorder %s3023_s11, %s3019_s10 }
  0x36   : > { %s336_s21 = sshll.u32 %s1881_s27, 4  ;;  %s282_s27 = sshll.u32 %s3054_s6, 4  ;;  %s337_s21 = int_to_ptr.hbm [resolvable:$true] %s336_s21  ;;  %s283_s27 = int_to_ptr.vmem [resolvable:$true] %s282_s27 }
  0x37   : > { %2553 = dma.hbm_to_vmem [thread:$0]  (!%p2551_p13), %s337_s21, 256, %s339_s0, %s3249_s4, %s3052_s3, %s3052_s3, %s3053_s8  }
  0x38   : > { %s280_s22 = sshll.u32 %s3651_s5, 4  ;;  %s36_s21 = sadd.s32 1, %s3039_s15  ;;  %s281_s22 = int_to_ptr.hbm [resolvable:$true] %s280_s22 }
  0x39   : > { %2546 = dma.hbm_to_vmem [thread:$0]  (!%p3200_p6), %s281_s22, 6144, %s283_s27, [#allocation9], %s3653_s30, %s3653_s30, %s3652_s7  }
  0x3a   : > { %s39_s3 = sadd.s32 1, %s3043_s16  ;;  %p37_p0 = scmp.ge.s32.totalorder %s36_s21, 2 }
  0x3b   : > { %s2418_s8 = sadd.s32 2, %s3210_s23  ;;  %p3278_p6 = por %p62_p7, %p61_p3 }
  0x3c   : > { %s3264_s2 = sadd.s32 4294967295, %s2418_s8  ;;  %s3705_s21 = smov (%p37_p0, %s36_s21), 0 }
  0x3d   : > { %3654 = sst [smem:[#allocation28_spill]] %s3705_s21  ;;  %s49_s19 = ssub.s32 %s3039_s15, %s3705_s21 }
  0x3e   : > { %s40_s6 = scalar_select %p37_p0, %s39_s3, %s3043_s16 }
  0x3f   : > { %s2422_s22 = sadd.s32 4, %s3210_s23  ;;  %p3287_p9 = por %p3622_p1, %p67_p8 }
  0x40   : > { %p41_p5 = scmp.ge.s32.totalorder %s40_s6, 4  ;;  %s228_s7 = sadd.s32 1, %s2991_s26 }
  0x41   : > { %s3657_s27 = scalar_select %p3287_p9, 1, 0 }
  0x42   : > { %s3707_s6 = smov (%p41_p5, %s40_s6), 0  ;;  %s3659_s4 = sadd.s32 1, %s3015_s9 }
  0x43   : > { %3656 = sst [smem:[#allocation29_spill]] %s3707_s6  ;;  %s2419_s10 = sshll.u32 %s3707_s6, 1 }
  0x44   : > { %3658 = sst [smem:[#allocation30_spill]] %s3657_s27  ;;  %s78_s8 = sadd.s32 1, %s3707_s6 }
  0x45   : > { %s2420_s0 = sadd.s32 2, %s2419_s10  ;;  %s80_s1 = ssub.s32 %s39_s3, %s78_s8 }
  0x46   : > { %s1999_s23 = sadd.s32 4294967295, %s2420_s0  ;;  %s81_s5 = sor.u32 %s80_s1, %s49_s19 }
  0x47   : > { %s50_s21 = ssub.s32 %s3264_s2, %s1999_s23  ;;  %p82_p11 = scmp.eq.s32.totalorder %s81_s5, 0 }
  0x48   : > { %s51_s14 = sor.u32 %s50_s21, %s49_s19  ;;  %s2424_s27 = sadd.s32 4, %s2419_s10 }
  0x49   : > { %p52_p13 = scmp.eq.s32.totalorder %s51_s14, 0  ;;  %s112_s11 = ssub.s32 %s2422_s22, %s2424_s27 }
  0x4a   : > { %s3298_s3 = scalar_select %p82_p11, %s3015_s9, %s3659_s4  }
  0x4b   : > { %s3301_s8 = scalar_select %p52_p13, %s3027_s12, %s54_s20  }
  0x4c   : > { %s113_s0 = sor.u32 %s112_s11, %s49_s19  ;;  %s224_s13 = ssub.s32 %s3043_s16, %s3707_s6 }
  0x4d   : > { %3660 = sst [smem:[#allocation31_spill]] %s3301_s8  ;;  %p3305_p0 = scmp.eq.s32.totalorder %s113_s0, 0 }
  0x4e   : > { %s225_s5 = sor.u32 %s224_s13, %s49_s19  ;;  %p238_p5 = scmp.ne.s32.totalorder %s2991_s26, %s2987_s25 }
  0x4f   : > { %p226_p3 = scmp.eq.s32.totalorder %s225_s5, 0  ;;  %p244_p8 = scmp.ne.s32.totalorder %s2987_s25, %s2983_s24 }
  0x50   : > { %s3662_s14 = sadd.s32 4294967294, %s3047_s17   ;;  %p3320_p11 = por %p239_p2, %p238_p5 }
  0x51   : > { %p245_p1 = scmp.eq.s32.totalorder %s3662_s14, 7  ;;  %s299_s13 = sand.u32 1, %s3027_s12  }
  0x52   : > { %s3316_s21 = scalar_select %p226_p3, %s2991_s26, %s228_s7  }
  0x53   : > { %p3324_p13 = por %p245_p1, %p244_p8  ;;  %s3665_s20 = smul.u32 12, %s3039_s15 }
  0x54   : > { %s3666_s19 = sld [smem:[#allocation17_spill]]  ;;  %s2006_s27 = sshll.u32 %s299_s13, 3 }
  0x55   : > { %s310_s22 = sadd.s32 %s3665_s20, %s3264_s2  ;;  %s3667_s7 = sld [smem:[#allocation26_spill]] }
  0x56   : > { %s2009_s10 = sshll.u32 %s310_s22, 3  ;;  %s3668_s5 = sld [smem:[#allocation32_spill]] }
  0x57   : > { %s303_s6 = scalar_lea.vmem [#allocation2], %s2006_s27  ;;  %p2548_p1 = pnand %p2563_p10, %p3278_p6 }
  0x58   : > { %s316_s16 = sshll.u32 %s303_s6, 4  ;;  %s300_s15 = scalar_lea.sflag [#allocation3], %s299_s13  ;;  %s317_s16 = int_to_ptr.vmem [resolvable:$true] %s316_s16 }
  0x59   : > { %s116_s2 = sadd.s32 1, %s3003_s29  ;;  %s3669_s20 = sld [smem:[#allocation27_spill]] }
  0x5a   : > { %s3343_s22 = scalar_select %p3305_p0, %s3003_s29, %s116_s2  }
  0x5b   : > { %p123_p2 = scmp.ne.s32.totalorder %s3003_s29, %s2999_s28  ;;  %p129_p3 = scmp.ne.s32.totalorder %s2999_s28, %s3666_s19 }
  0x5c   : > { %s312_s14 = scalar_lea.hbm %s3668_s5, %s2009_s10  ;;  %s350_s10 = sand.u32 1, %s3003_s29  }
  0x5d   : > { %s314_s8 = sshll.u32 %s312_s14, 4  ;;  %s3670_s23 = sshll.u32 %s3667_s7, 3  ;;  %s315_s8 = int_to_ptr.hbm [resolvable:$true] %s314_s8 }
  0x5e   : > { %2550 = dma.hbm_to_vmem [thread:$0]  (!%p2548_p1), %s315_s8, 128, %s317_s16, %s300_s15  }
  0x5f   : > { %s3671_s0 = sld [smem:[#allocation34_spill]]  ;;  %p125_p5 = por %p123_p2, %p62_p7 }
  0x60   : > { %p3672_p8 = scmp.eq.s32.totalorder %s3183_s18, 0  ;;  %s2013_s15 = sshll.u32 %s350_s10, 3 }
  0x61   : > { %s352_s1 = scalar_lea.vmem [#allocation7], %s2013_s15  ;;  %p2554_p0 = pnand %p2563_p10, %p125_p5 }
  0x62   : > { %p3359_p6 = por %p129_p3, %p3672_p8  ;;  %s364_s13 = sshll.u32 %s352_s1, 4  ;;  %s365_s13 = int_to_ptr.vmem [resolvable:$true] %s364_s13 }
  0x63   : > { %s3675_s7 = sld [smem:[#allocation19_spill]] (!%p3192_p4) }
  0x64   : > { %373 = sbr.rel (%p3192_p4) target bundleno = 840 (0x348), region = 48 }
  0x65   : > { %s1889_s5 = scalar_lea.hbm %s3671_s0, %s3670_s23 }
  0x66   : > { %s1890_s16 = scalar_lea.hbm %s1889_s5, 32 }
  0x67   : > { %s362_s8 = sshll.u32 %s1890_s16, 4  ;;  %s363_s8 = int_to_ptr.hbm [resolvable:$true] %s362_s8 }
  0x68   : > { %2556 = dma.hbm_to_vmem [thread:$0]  (!%p2554_p0), %s363_s8, 128, %s365_s13, %s3669_s20  }
  0x69   : > { %s375_s2 = sand.u32 1, %s3675_s7  }
  0x6a   : > { %s3369_s23 = sshll.u32 %s375_s2, 3  ;;  %s376_s27 = scalar_lea.sflag [#allocation3], %s375_s2 }
  0x6b   : > { %s379_s10 = scalar_lea.vmem [#allocation2], %s3369_s23 }
  0x6c   : > { %2962 = dma.done.wait (%p3287_p9), %s376_s27, 128  }
  0x6d   : > { %2964 = vsyncadd (%p3287_p9), %s376_s27, 4294967168  ;;  %s3677_s6 = sld [smem:[#allocation18_spill]]  ;;  %s385_s20 = sand.u32 1, %s3183_s18  }
  0x6e   : > { %s386_s16 = scalar_lea.sflag [#allocation6], %s385_s20 }
  0x73   : > { %s387_s5 = sand.u32 1, %s3677_s6  }
  0x74   : > { %s3378_s15 = sshll.u32 %s387_s5, 4 }
  0x75   : > { %s389_s8 = scalar_lea.vmem [#allocation5], %s3378_s15 }
  0x76   : > { %2966 = dma.done.wait (%p3228_p12), %s386_s16, 256  }
  0x77   : > { %2968 = vsyncadd (%p3228_p12), %s386_s16, 4294967040  ;;  %s397_s1 = sand.u32 1, %s2999_s28  }
  0x78   : > { %s3386_s13 = sshll.u32 %s397_s1, 3 }
  0x79   : > { %s399_s19 = scalar_lea.vmem [#allocation7], %s3386_s13 }
  0x7a   : > { %2970 = dma.done.wait (%p3359_p6), %s386_s16, 128  }
  0x7b   : > { %2972 = vsyncadd (%p3359_p6), %s386_s16, 4294967168  ;;  %p3679_p4 = scmp.eq.s32.totalorder %s3183_s18, 0 }
  0x7d   : > { %2974 = dma.done.wait (%p3679_p4), [#allocation9], 12288   ;;  %p3680_p7 = pmov %p3679_p4 }
  0x7e   : > { %v2434_v0 = vld [vmem:[#allocation8 + $0x38] sm:$0xff]  ;;  %v2433_v3 = vld [vmem:[#allocation8 + $0x30] sm:$0xff]  ;;  %v2432_v6 = vld [vmem:[#allocation8 + $0x28] sm:$0xff]  ;;  %vm539_vm4 = vsmask.f32 7424  ;;  %vm557_vm5 = vcmask 1046528  }
  0x7f   : > { %2976 = vsyncadd (%p3680_p7), [#allocation9], 4294955008  ;;  %v2442_v1 = vld [vmem:[#allocation8 + $0x78] sm:$0xff]  ;;  %711 = vmatpush.bf16.msra.mxu0 %v2434_v0  ;;  %v2441_v4 = vld [vmem:[#allocation8 + $0x70] sm:$0xff]  ;;  %s3681_s18 = sld [smem:[#allocation21_spill]]  ;;  %s448_s13 = sand.u32 1, %s2987_s25  }
  0x80   : > { %v2450_v2 = vld [vmem:[#allocation8 + $0xb8] sm:$0xff]  ;;  %730 = vmatpush.bf16.msra.mxu1 %v2442_v1  ;;  %v2449_v5 = vld [vmem:[#allocation8 + $0xb0] sm:$0xff]  ;;  %v2440_v7 = vld [vmem:[#allocation8 + $0x68] sm:$0xff]  ;;  %s3682_s23 = sld [smem:[#allocation36_spill]]  ;;  %s1818_s16 = scalar_lea.sflag [#allocation4], %s448_s13 }
  0x81   : > { %749 = vmatpush.bf16.msra.mxu2 %v2450_v2  ;;  %v2448_v8 = vld [vmem:[#allocation8 + $0xa8] sm:$0xff]  ;;  %v2431_v9 = vld [vmem:[#allocation8 + $0x20] sm:$0xff]  ;;  %v3411_v16 = vld [vmem:[%s399_s19] sm:$0xff]  ;;  %s3683_s6 = sld [smem:[#allocation38_spill]]  ;;  %s2022_s19 = sshll.u32 %s448_s13, 4 }
  0x82   : > { %v2439_v10 = vld [vmem:[#allocation8 + $0x60] sm:$0xff]  ;;  %v3403_v13 = vld [vmem:[%s389_s8 + $0x8] sm:$0xff]  ;;  %vm466_vm3 = vcmp.ge.f32.partialorder %v3411_v16, 0.0  ;;  %v470_v21 = vmul.f32 0.1, %v3411_v16  ;;  %v2429_v36 = vld [vmem:[#allocation8 + $0x10] sm:$0xff] }
  0x83   : > { %712 = vmatpush.bf16.msra.mxu0 %v2433_v3  ;;  %v3399_v11 = vld [vmem:[%s379_s10] sm:$0xff]  ;;  %v3401_v12 = vld [vmem:[%s389_s8] sm:$0xff]  ;;  %vm465_vm2 = vcmp.ge.f32.partialorder %v3403_v13, 0.0  ;;  %v469_v17 = vmul.f32 0.1, %v3403_v13  ;;  %v2430_v27 = vld [vmem:[#allocation8 + $0x18] sm:$0xff] }
  0x84   : > { %731 = vmatpush.bf16.msra.mxu1 %v2441_v4  ;;  %vm463_vm0 = vcmp.ge.f32.partialorder %v3399_v11, 0.0  ;;  %vm464_vm1 = vcmp.ge.f32.partialorder %v3401_v12, 0.0  ;;  %v467_v14 = vmul.f32 0.1, %v3399_v11  ;;  %v468_v15 = vmul.f32 0.1, %v3401_v12 }
  0x85   : > { %750 = vmatpush.bf16.msra.mxu2 %v2449_v5  ;;  %v2447_v18 = vld [vmem:[#allocation8 + $0xa0] sm:$0xff]  ;;  %v473_v24 = vsel %vm465_vm2, %v3403_v13, %v469_v17  ;;  %v474_v25 = vsel %vm466_vm3, %v3411_v16, %v470_v21  ;;  %v2438_v28 = vld [vmem:[#allocation8 + $0x58] sm:$0xff]  ;;  %v2437_v37 = vld [vmem:[#allocation8 + $0x50] sm:$0xff]  ;;  %s3424_s30 = sshll.u32 %s3681_s18, 4  ;;  %s3684_s1 = sld [smem:[#allocation20_spill]] }
  0x86   : > { %v471_v19 = vsel %vm463_vm0, %v3399_v11, %v467_v14  ;;  %v472_v20 = vsel %vm464_vm1, %v3401_v12, %v468_v15  ;;  %v477_v26 = vpack.c.bf16 %v473_v24, %v473_v24  ;;  %v478_v31 = vpack.c.bf16 %v474_v25, %v474_v25  ;;  %v2446_v32 = vld [vmem:[#allocation8 + $0x98] sm:$0xff]  ;;  %v2445_v41 = vld [vmem:[#allocation8 + $0x90] sm:$0xff]  ;;  %v2428_v42 = vld [vmem:[#allocation8 + $0x8] sm:$0xff]  ;;  %s769_s7 = sadd.s32 4294967289, %s3424_s30  ;;  %s2216_s0 = sadd.s32 4294967290, %s3424_s30 }
  0x87   : > { %713 = vmatpush.bf16.msra.mxu0 %v2432_v6  ;;  %v475_v22 = vpack.c.bf16 %v471_v19, %v471_v19  ;;  %v476_v23 = vpack.c.bf16 %v472_v20, %v472_v20  ;;  %v2458_v40 = vld [vmem:[#allocation10 + $0x38] sm:$0xff]  ;;  %v2436_v43 = vld [vmem:[#allocation8 + $0x48] sm:$0xff]  ;;  %v2427_v48 = vld [vmem:[#allocation8] sm:$0xff]  ;;  %v3434_v17 = vstv %s769_s7  ;;  %s1480_s20 = sadd.s32 4294967293, %s3424_s30  ;;  %s2412_s30 = sshll.u32 %s3681_s18, 1 }
  0x88   : > { %732 = vmatpush.bf16.msra.mxu1 %v2440_v7  ;;  %v533_v33 = vunpack.c.l.b16 %v477_v26  ;;  %v534_v35 = vunpack.c.l.b16 %v478_v31  ;;  %1050 = vmatpush.bf16.msra.mxu3 %v2458_v40  ;;  %v2444_v47 = vld [vmem:[#allocation8 + $0x88] sm:$0xff]  ;;  %v2435_v49 = vld [vmem:[#allocation8 + $0x40] sm:$0xff]  ;;  %v2457_v59 = vld [vmem:[#allocation10 + $0x30] sm:$0xff]  ;;  %v770_v7 = vlaneseq  ;;  %s450_s14 = scalar_lea.vmem [#allocation11], %s2022_s19 }
  0x89   : > { %751 = vmatpush.bf16.msra.mxu2 %v2448_v8  ;;  %v531_v29 = vunpack.c.l.b16 %v475_v22  ;;  %v532_v30 = vunpack.c.l.b16 %v476_v23  ;;  %v2443_v52 = vld [vmem:[#allocation8 + $0x80] sm:$0xff]  ;;  %v2456_v60 = vld [vmem:[#allocation10 + $0x28] sm:$0xff]  ;;  %v2454_v62 = vld [vmem:[#allocation10 + $0x18] sm:$0xff]  ;;  %s1832_s5 = sshll.u32 %s450_s14, 4  ;;  %s1833_s5 = int_to_ptr.vmem [resolvable:$true] %s1832_s5 }
  0x8a   : > { %v536_v38 = vpack.c.b16 %v534_v35, %v533_v33  ;;  %v2455_v61 = vld [vmem:[#allocation10 + $0x20] sm:$0xff]  ;;  %v2474_v63 = vld [vmem:[#allocation10 + $0xb8] sm:$0xff]  ;;  %v2453_v0 = vld [vmem:[#allocation10 + $0x10] sm:$0xff] }
  0x8b   : > { %714 = vmatpush.bf16.msra.mxu0 %v2431_v9  ;;  %v535_v34 = vpack.c.b16 %v532_v30, %v531_v29  ;;  %v2466_v1 = vld [vmem:[#allocation10 + $0x78] sm:$0xff]  ;;  %v2473_v2 = vld [vmem:[#allocation10 + $0xb0] sm:$0xff]  ;;  %v2452_v3 = vld [vmem:[#allocation10 + $0x8] sm:$0xff]  ;;  %s2413_s7 = sshll.u32 %s3684_s1, 3 }
  0x8c   : > { %733 = vmatpush.bf16.msra.mxu1 %v2439_v10  ;;  %v548_v46 = vshll.u32 %v536_v38, 16  ;;  %v559_v54 = vrot.slane %v536_v38, 1  ;;  %v552_v57 = vshrl.u32 %v536_v38, 16  ;;  %1051 = vmatpush.bf16.msra.mxu3 %v2457_v59  ;;  %v2465_v4 = vld [vmem:[#allocation10 + $0x70] sm:$0xff]  ;;  %v2472_v5 = vld [vmem:[#allocation10 + $0xa8] sm:$0xff]  ;;  %v2451_v6 = vld [vmem:[#allocation10] sm:$0xff]  ;;  %s1829_s2 = sadd.s32 %s2413_s7, %s2412_s30 }
  0x8d   : > { %752 = vmatpush.bf16.msra.mxu2 %v2447_v18  ;;  %v543_v39 = vshll.u32 %v535_v34, 16  ;;  %v541_v44 = vshrl.u32 %v535_v34, 16  ;;  %v558_v53 = vrot.slane %v535_v34, 1  ;;  %v2464_v8 = vld [vmem:[#allocation10 + $0x68] sm:$0xff]  ;;  %v2471_v9 = vld [vmem:[#allocation10 + $0xa0] sm:$0xff]  ;;  %v3427_v10 = vshrl.u32 %v770_v7, 7 }
  0x8e   : > { %v550_v51 = vrot.slane %v548_v46, 1  ;;  %v2463_v14 = vld [vmem:[#allocation10 + $0x60] sm:$0xff]  ;;  %v2470_v18 = vld [vmem:[#allocation10 + $0x98] sm:$0xff]  ;;  %v2469_v24 = vld [vmem:[#allocation10 + $0x90] sm:$0xff]  ;;  %s2414_s27 = sshll.u32 %s1829_s2, 3 }
  0x8f   : > { %715 = vmatpush.bf16.msra.mxu0 %v2430_v27  ;;  %v545_v45 = vrot.slane %v543_v39, 1  ;;  %v560_v56 = vsel %vm557_vm5, %v558_v53, %v559_v54  ;;  %v3432_v15 = vld [vmem:[%s3682_s23] ss:$0 sm:$0xff]  ;;  %v776_v21 = vadd.s32 %v3434_v17, %v3427_v10  ;;  %v2462_v22 = vld [vmem:[#allocation10 + $0x58] sm:$0xff]  ;;  %v3440_v26 = vadd.s32 8, %v3427_v10  ;;  %v2461_v27 = vld [vmem:[#allocation10 + $0x50] sm:$0xff] }
  0x90   : > { %734 = vmatpush.bf16.msra.mxu1 %v2438_v28  ;;  %v554_v58 = vor.u32 %v552_v57, %v550_v51  ;;  %1052 = vmatpush.bf16.msra.mxu3 %v2456_v60  ;;  %v2468_v28 = vld [vmem:[#allocation10 + $0x88] sm:$0xff]  ;;  %v2459_v39 = vld [vmem:[#allocation10 + $0x40] sm:$0xff]  ;;  %v3452_v53 = vadd.s32 24, %v3427_v10 }
  0x91   : > { %753 = vmatpush.bf16.msra.mxu2 %v2446_v32  ;;  %v546_v50 = vor.u32 %v545_v45, %v541_v44  ;;  %vm780_vm6 = vcmp.ge.s32.totalorder %v776_v21, 0  ;;  %vm784_vm7 = vcmp.lt.s32.totalorder %v776_v21, 50  ;;  %v777_v32 = vadd.s32 %v3434_v17, %v3440_v26  ;;  %v2460_v33 = vld [vmem:[#allocation10 + $0x48] sm:$0xff] }
  0x92   : > { %vm788_vm8 = vmand %vm780_vm6, %vm784_vm7 }
  0x93   : > { %716 = vmatpush.bf16.msra.mxu0 %v2429_v36  ;;  %v551_v55 = vsel %vm539_vm4, %v546_v50, %v550_v51  ;;  %vm781_vm9 = vcmp.ge.s32.totalorder %v777_v32, 0  ;;  %vm785_vm10 = vcmp.lt.s32.totalorder %v777_v32, 50 }
  0x94   : > { %735 = vmatpush.bf16.msra.mxu1 %v2437_v37  ;;  %1053 = vmatpush.bf16.msra.mxu3 %v2455_v61  ;;  %v2467_v37 = vld [vmem:[#allocation10 + $0x80] sm:$0xff]  ;;  %vm789_vm12 = vmand %vm781_vm9, %vm785_vm10  ;;  %v779_v61 = vadd.s32 %v3434_v17, %v3452_v53 }
  0x95   : > { %754 = vmatpush.bf16.msra.mxu2 %v2445_v41 }
  0x96   : > { %vm783_vm1 = vcmp.ge.s32.totalorder %v779_v61, 0  ;;  %vm787_vm2 = vcmp.lt.s32.totalorder %v779_v61, 50 }
  0x97   : > { %717 = vmatpush.bf16.msra.mxu0 %v2428_v42  ;;  %vm791_vm6 = vmand %vm783_vm1, %vm787_vm2 }
  0x98   : > { %736 = vmatpush.bf16.msra.mxu1 %v2436_v43  ;;  %1054 = vmatpush.bf16.msra.mxu3 %v2454_v62 }
  0x99   : > { %755 = vmatpush.bf16.msra.mxu2 %v2444_v47 }
  0x9b   : > { %718 = vmatpush.bf16.msra.mxu0 %v2427_v48 }
  0x9c   : > { %737 = vmatpush.bf16.msra.mxu1 %v2435_v49  ;;  %1055 = vmatpush.bf16.msra.mxu3 %v2453_v0 }
  0x9d   : > { %756 = vmatpush.bf16.msra.mxu2 %v2443_v52 }
  0x9e   : > { %719 = vmatmul.bf16.vlgmr.msra.gmra.mxu0 %v535_v34 }
  0x9f   : > { %738 = vmatmul.bf16.vlgmr.msra.gmra.mxu1 %v551_v55  ;;  %1069 = vmatpush.bf16.msrb.mxu0 %v2466_v1 }
  0xa0   : > { %757 = vmatmul.bf16.vlgmr.msra.gmra.mxu2 %v560_v56  ;;  %1088 = vmatpush.bf16.msrb.mxu1 %v2474_v63 }
  0xa1   : > { %1056 = vmatpush.bf16.msra.mxu3 %v2452_v3 }
  0xa3   : > { %1070 = vmatpush.bf16.msrb.mxu0 %v2465_v4 }
  0xa4   : > { %1089 = vmatpush.bf16.msrb.mxu1 %v2473_v2 }
  0xa5   : > { %1057 = vmatpush.bf16.msra.mxu3 %v2451_v6 }
  0xa7   : > { %1071 = vmatpush.bf16.msrb.mxu0 %v2464_v8 }
  0xa8   : > { %1090 = vmatpush.bf16.msrb.mxu1 %v2472_v5 }
  0xab   : > { %1072 = vmatpush.bf16.msrb.mxu0 %v2463_v14 }
  0xac   : > { %1091 = vmatpush.bf16.msrb.mxu1 %v2471_v9 }
  0xae   : > { %724 = vmatmul.bf16.gmra.mxu0 %v536_v38  ;;  %v3446_v38 = vadd.s32 16, %v3427_v10 }
  0xaf   : > { %743 = vmatmul.bf16.gmra.mxu1 %v554_v58  ;;  %1073 = vmatpush.bf16.msrb.mxu0 %v2462_v22 }
  0xb0   : > { %762 = vmatmul.bf16.gmra.mxu2 %v559_v54  ;;  %1092 = vmatpush.bf16.msrb.mxu1 %v2470_v18  ;;  %v778_v43 = vadd.s32 %v3434_v17, %v3446_v38 }
  0xb2   : > { %vm782_vm14 = vcmp.ge.s32.totalorder %v778_v43, 0  ;;  %vm786_vm15 = vcmp.lt.s32.totalorder %v778_v43, 50  ;;  %v2489_v43 = vld [vmem:[#allocation8 + $0x130] sm:$0xff] }
  0xb3   : > { %1074 = vmatpush.bf16.msrb.mxu0 %v2461_v27  ;;  %vm790_vm0 = vmand %vm782_vm14, %vm786_vm15 }
  0xb4   : > { %1093 = vmatpush.bf16.msrb.mxu1 %v2469_v24 }
  0xb7   : > { %1075 = vmatpush.bf16.msrb.mxu0 %v2460_v33  ;;  %v2482_v33 = vld [vmem:[#allocation8 + $0xf8] sm:$0xff] }
  0xb8   : > { %1094 = vmatpush.bf16.msrb.mxu1 %v2468_v28  ;;  %1426 = vmatpush.bf16.msrb.mxu2 %v2482_v33 }
  0xbb   : > { %1076 = vmatpush.bf16.msrb.mxu0 %v2459_v39  ;;  %v2490_v39 = vld [vmem:[#allocation8 + $0x138] sm:$0xff] }
  0xbc   : > { %1095 = vmatpush.bf16.msrb.mxu1 %v2467_v37  ;;  %v2479_v37 = vld [vmem:[#allocation8 + $0xe0] sm:$0xff]  ;;  %1444 = vmatpush.bf16.msrb.mxu3 %v2490_v39 }
  0xc0   : > { %1445 = vmatpush.bf16.msrb.mxu3 %v2489_v43 }
 0x11b   : > { %v720_v19 = vpop.f32.mrf.mxu0 }
 0x11c   : > { %v739_v20 = vpop.f32.mrf.mxu1  ;;  %v721_v23 = vadd.f32 %v3432_v15, %v720_v19 }
 0x11e   : > { %v740_v25 = vadd.f32 %v739_v20, %v721_v23 }
 0x123   : > { %v758_v29 = vpop.f32.mrf.mxu2  ;;  %v722_v31 = vpop.f32.mrf.mxu0 }
 0x124   : > { %v759_v30 = vadd.f32 %v758_v29, %v740_v25  ;;  %v741_v34 = vpop.f32.mrf.mxu1  ;;  %v723_v36 = vadd.f32 %v3432_v15, %v722_v31 }
 0x126   : > { %v800_v35 = vsel %vm788_vm8, %v759_v30, 0.0  ;;  %v742_v41 = vadd.f32 %v741_v34, %v723_v36  ;;  %v2481_v34 = vld [vmem:[#allocation8 + $0xf0] sm:$0xff]  ;;  %v2498_v36 = vld [vmem:[#allocation8 + $0x178] sm:$0xff]  ;;  %vm1111_vm8 = vcmask 1041408  }
 0x127   : > { %v808_v40 = vmul.f32 0.1, %v800_v35  ;;  %vm804_vm11 = vcmp.ge.f32.partialorder %v800_v35, 0.0  ;;  %1427 = vmatpush.bf16.msrb.mxu2 %v2481_v34  ;;  %1462 = vmatpush.bf16.msra.mxu0 %v2498_v36 }
 0x129   : > { %v812_v46 = vsel %vm804_vm11, %v800_v35, %v808_v40  ;;  %v2480_v35 = vld [vmem:[#allocation8 + $0xe8] sm:$0xff]  ;;  %v2497_v40 = vld [vmem:[#allocation8 + $0x170] sm:$0xff]  ;;  %vm1157_vm11 = vcmask 1045504  }
 0x12a   : > { %v816_v51 = vpack.c.bf16 %v812_v46, %v812_v46  ;;  %v3462_v46 = vld [vmem:[%s3683_s6] ss:$0 sm:$0xff] }
 0x12b   : > { %v760_v42 = vpop.f32.mrf.mxu2  ;;  %v725_v45 = vpop.f32.mrf.mxu0  ;;  %1428 = vmatpush.bf16.msrb.mxu2 %v2480_v35  ;;  %1463 = vmatpush.bf16.msra.mxu0 %v2497_v40 }
 0x12c   : > { %v761_v44 = vadd.f32 %v760_v42, %v742_v41  ;;  %v726_v47 = vadd.f32 %v3432_v15, %v725_v45  ;;  %v744_v50 = vpop.f32.mrf.mxu1  ;;  %v872_v57 = vunpack.c.l.b16 %v816_v51  ;;  %v2478_v42 = vld [vmem:[#allocation8 + $0xd8] sm:$0xff]  ;;  %v2477_v45 = vld [vmem:[#allocation8 + $0xd0] sm:$0xff] }
 0x12e   : > { %v801_v48 = vsel %vm789_vm12, %v761_v44, 0.0  ;;  %v745_v52 = vadd.f32 %v744_v50, %v726_v47  ;;  %v2496_v44 = vld [vmem:[#allocation8 + $0x168] sm:$0xff] }
 0x12f   : > { %vm805_vm13 = vcmp.ge.f32.partialorder %v801_v48, 0.0  ;;  %v809_v49 = vmul.f32 0.1, %v801_v48  ;;  %1429 = vmatpush.bf16.msrb.mxu2 %v2479_v37  ;;  %1464 = vmatpush.bf16.msra.mxu0 %v2496_v44  ;;  %v2488_v47 = vld [vmem:[#allocation8 + $0x128] sm:$0xff] }
 0x130   : > { %v2476_v50 = vld [vmem:[#allocation8 + $0xc8] sm:$0xff]  ;;  %1446 = vmatpush.bf16.msrb.mxu3 %v2488_v47 }
 0x131   : > { %v813_v54 = vsel %vm805_vm13, %v801_v48, %v809_v49  ;;  %v2495_v48 = vld [vmem:[#allocation8 + $0x160] sm:$0xff] }
 0x132   : > { %v817_v55 = vpack.c.bf16 %v813_v54, %v813_v54 }
 0x133   : > { %v763_v56 = vpop.f32.mrf.mxu2  ;;  %v727_v60 = vpop.f32.mrf.mxu0  ;;  %1430 = vmatpush.bf16.msrb.mxu2 %v2478_v42  ;;  %1465 = vmatpush.bf16.msra.mxu0 %v2495_v48 }
 0x134   : > { %v873_v58 = vunpack.c.l.b16 %v817_v55  ;;  %v764_v59 = vadd.f32 %v763_v56, %v745_v52  ;;  %v728_v63 = vadd.f32 %v3432_v15, %v727_v60  ;;  %v746_v2 = vpop.f32.mrf.mxu1  ;;  %v2487_v55 = vld [vmem:[#allocation8 + $0x120] sm:$0xff]  ;;  %v2494_v56 = vld [vmem:[#allocation8 + $0x158] sm:$0xff]  ;;  %v2493_v60 = vld [vmem:[#allocation8 + $0x150] sm:$0xff] }
 0x135   : > { %1447 = vmatpush.bf16.msrb.mxu3 %v2487_v55 }
 0x136   : > { %v802_v62 = vsel %vm790_vm0, %v764_v59, 0.0  ;;  %v876_v0 = vpack.c.b16 %v873_v58, %v872_v57  ;;  %v747_v3 = vadd.f32 %v746_v2, %v728_v63  ;;  %v2475_v58 = vld [vmem:[#allocation8 + $0xc0] sm:$0xff]  ;;  %v2486_v59 = vld [vmem:[#allocation8 + $0x118] sm:$0xff] }
 0x137   : > { %v810_v1 = vmul.f32 0.1, %v802_v62  ;;  %vm806_vm3 = vcmp.ge.f32.partialorder %v802_v62, 0.0  ;;  %1431 = vmatpush.bf16.msrb.mxu2 %v2477_v45  ;;  %1466 = vmatpush.bf16.msra.mxu0 %v2494_v56 }
 0x138   : > { %1058 = vmatmul.bf16.vlgmr.msra.gmra.mxu3 %v876_v0  ;;  %v883_v18 = vshll.u32 %v876_v0, 16  ;;  %v897_v22 = vrot.slane %v876_v0, 1  ;;  %v881_v24 = vshrl.u32 %v876_v0, 16  ;;  %v1128_v0 = vstv %s2216_s0  ;;  %s3685_s0 = sld [smem:[#allocation39_spill]] }
 0x139   : > { %v814_v6 = vsel %vm806_vm3, %v802_v62, %v810_v1  ;;  %1448 = vmatpush.bf16.msrb.mxu3 %v2486_v59  ;;  %v1132_v39 = vadd.s32 %v1128_v0, %v3452_v53  ;;  %v1131_v43 = vadd.s32 %v1128_v0, %v3446_v38 }
 0x13a   : > { %v818_v9 = vpack.c.bf16 %v814_v6, %v814_v6  ;;  %v885_v21 = vrot.slane %v883_v18, 1 }
 0x13b   : > { %v765_v4 = vpop.f32.mrf.mxu2  ;;  %1432 = vmatpush.bf16.msrb.mxu2 %v2476_v50  ;;  %1467 = vmatpush.bf16.msra.mxu0 %v2493_v60  ;;  %vm1136_vm1 = vcmp.ge.s32.totalorder %v1132_v39, 0  ;;  %vm1140_vm2 = vcmp.lt.s32.totalorder %v1132_v39, 50  ;;  %v2511_v39 = vld [vmem:[#allocation10 + $0x120] sm:$0xff] }
 0x13c   : > { %v766_v5 = vadd.f32 %v765_v4, %v747_v3  ;;  %v874_v15 = vunpack.c.l.b16 %v818_v9  ;;  %v886_v28 = vor.u32 %v885_v21, %v881_v24  ;;  %v2485_v3 = vld [vmem:[#allocation8 + $0x110] sm:$0xff]  ;;  %v2492_v4 = vld [vmem:[#allocation8 + $0x148] sm:$0xff] }
 0x13d   : > { %1449 = vmatpush.bf16.msrb.mxu3 %v2485_v3  ;;  %v2484_v9 = vld [vmem:[#allocation8 + $0x108] sm:$0xff] }
 0x13e   : > { %v803_v7 = vsel %vm791_vm6, %v766_v5, 0.0  ;;  %vm1135_vm6 = vcmp.ge.s32.totalorder %v1131_v43, 0  ;;  %s2885_s7 = scalar_lea.hbm %s3685_s0, 128 }
 0x13f   : > { %vm807_vm7 = vcmp.ge.f32.partialorder %v803_v7, 0.0  ;;  %v811_v8 = vmul.f32 0.1, %v803_v7  ;;  %1433 = vmatpush.bf16.msrb.mxu2 %v2475_v58  ;;  %1468 = vmatpush.bf16.msra.mxu0 %v2492_v4 }
 0x141   : > { %v815_v14 = vsel %vm807_vm7, %v803_v7, %v811_v8  ;;  %v1129_v8 = vadd.s32 %v1128_v0, %v3427_v10  ;;  %1450 = vmatpush.bf16.msrb.mxu3 %v2484_v9  ;;  %vm1139_vm7 = vcmp.lt.s32.totalorder %v1131_v43, 50  ;;  %v2510_v43 = vld [vmem:[#allocation10 + $0x118] sm:$0xff] }
 0x142   : > { %v819_v17 = vpack.c.bf16 %v815_v14, %v815_v14  ;;  %v2491_v14 = vld [vmem:[#allocation8 + $0x140] sm:$0xff] }
 0x143   : > { %vm1133_vm9 = vcmp.ge.s32.totalorder %v1129_v8, 0  ;;  %vm1137_vm10 = vcmp.lt.s32.totalorder %v1129_v8, 50  ;;  %1469 = vmatpush.bf16.msra.mxu0 %v2491_v14 }
 0x144   : > { %v875_v19 = vunpack.c.l.b16 %v819_v17  ;;  %vm1141_vm12 = vmand %vm1133_vm9, %vm1137_vm10 }
 0x145   : > { %vm1144_vm9 = vmand %vm1136_vm1, %vm1140_vm2 }
 0x146   : > { %v877_v20 = vpack.c.b16 %v875_v19, %v874_v15  ;;  %vm1143_vm10 = vmand %vm1135_vm6, %vm1139_vm7 }
 0x148   : > { %1063 = vmatmul.bf16.gmra.mxu3 %v877_v20  ;;  %v898_v23 = vrot.slane %v877_v20, 1  ;;  %v888_v25 = vshll.u32 %v877_v20, 16  ;;  %v892_v31 = vshrl.u32 %v877_v20, 16  ;;  %v2483_v20 = vld [vmem:[#allocation8 + $0x100] sm:$0xff] }
 0x149   : > { %1451 = vmatpush.bf16.msrb.mxu3 %v2483_v20 }
 0x14a   : > { %v899_v27 = vsel %vm557_vm5, %v897_v22, %v898_v23  ;;  %v890_v29 = vrot.slane %v888_v25, 1 }
 0x14b   : > { %1096 = vmatmul.bf16.vlgmr.msrb.gmra.mxu1 %v899_v27 }
 0x14c   : > { %v891_v30 = vsel %vm539_vm4, %v886_v28, %v890_v29  ;;  %v894_v32 = vor.u32 %v892_v31, %v890_v29 }
 0x14d   : > { %1077 = vmatmul.bf16.vlgmr.msrb.gmra.mxu0 %v891_v30 }
 0x15b   : > { %1101 = vmatmul.bf16.gmra.mxu1 %v898_v23 }
 0x15d   : > { %1082 = vmatmul.bf16.gmra.mxu0 %v894_v32 }
 0x1bb   : > { %v1059_v41 = vpop.f32.mrf.mxu3 }
 0x1bc   : > { %v1060_v51 = vadd.f32 %v3462_v46, %v1059_v41 }
 0x1c3   : > { %v1061_v52 = vpop.f32.mrf.mxu3 }
 0x1c4   : > { %v1062_v63 = vadd.f32 %v3462_v46, %v1061_v52 }
 0x1c8   : > { %v1097_v49 = vpop.f32.mrf.mxu1 }
 0x1ca   : > { %v1078_v54 = vpop.f32.mrf.mxu0 }
 0x1cb   : > { %v1079_v57 = vadd.f32 %v1078_v54, %v1060_v51  ;;  %v1064_v6 = vpop.f32.mrf.mxu3 }
 0x1cc   : > { %v1065_v15 = vadd.f32 %v3462_v46, %v1064_v6 }
 0x1cd   : > { %v1098_v61 = vadd.f32 %v1097_v49, %v1079_v57 }
 0x1cf   : > { %v1112_v5 = vrot.slane %v1098_v61, 6 }
 0x1d0   : > { %v1099_v62 = vpop.f32.mrf.mxu1 }
 0x1d1   : > { %v1123_v18 = vadd.f32 %v1112_v5, %v3399_v11  ;;  %v1130_v11 = vadd.s32 %v1128_v0, %v3440_v26 }
 0x1d2   : > { %v1080_v1 = vpop.f32.mrf.mxu0 }
 0x1d3   : > { %v1081_v2 = vadd.f32 %v1080_v1, %v1062_v63  ;;  %v1158_v25 = vrot.slane %v1123_v18, 2  ;;  %v1066_v30 = vpop.f32.mrf.mxu3  ;;  %vm1134_vm13 = vcmp.ge.s32.totalorder %v1130_v11, 0  ;;  %vm1138_vm14 = vcmp.lt.s32.totalorder %v1130_v11, 50  ;;  %v2503_v11 = vld [vmem:[#allocation10 + $0xe0] sm:$0xff] }
 0x1d4   : > { %v1067_v33 = vadd.f32 %v3462_v46, %v1066_v30  ;;  %vm1142_vm0 = vmand %vm1134_vm13, %vm1138_vm14  ;;  %vm1251_vm13 = vsmask.f32 6400  ;;  %v2521_v30 = vld [vmem:[#allocation10 + $0x170] sm:$0xff] }
 0x1d5   : > { %v1100_v7 = vadd.f32 %v1099_v62, %v1081_v2 }
 0x1d7   : > { %v1113_v17 = vrot.slane %v1100_v7, 6 }
 0x1d8   : > { %v1102_v22 = vpop.f32.mrf.mxu1 }
 0x1d9   : > { %v1114_v19 = vsel %vm1111_vm8, %v1112_v5, %v1113_v17 }
 0x1da   : > { %v1124_v21 = vadd.f32 %v1114_v19, %v3401_v12  ;;  %v1083_v23 = vpop.f32.mrf.mxu0 }
 0x1db   : > { %v1084_v24 = vadd.f32 %v1083_v23, %v1065_v15 }
 0x1dc   : > { %v1159_v27 = vrot.slane %v1124_v21, 2 }
 0x1dd   : > { %v1103_v28 = vadd.f32 %v1102_v22, %v1084_v24  ;;  %v2506_v24 = vld [vmem:[#allocation10 + $0xf8] sm:$0xff] }
 0x1de   : > { %v1160_v29 = vsel %vm1157_vm11, %v1158_v25, %v1159_v27  ;;  %1745 = vmatpush.bf16.msra.mxu1 %v2506_v24  ;;  %v2505_v25 = vld [vmem:[#allocation10 + $0xf0] sm:$0xff] }
 0x1df   : > { %v1115_v31 = vrot.slane %v1103_v28, 6  ;;  %v3474_v32 = vsel %vm1141_vm12, %v1160_v29, 0.0  ;;  %v2522_v28 = vld [vmem:[#allocation10 + $0x178] sm:$0xff] }
 0x1e0   : > { %v1177_v36 = vmul.f32 0.1, %v3474_v32  ;;  %vm1173_vm15 = vcmp.ge.f32.partialorder %v3474_v32, 0.0  ;;  %v1104_v41 = vpop.f32.mrf.mxu1  ;;  %1781 = vmatpush.bf16.msra.mxu3 %v2522_v28  ;;  %v2514_v29 = vld [vmem:[#allocation10 + $0x138] sm:$0xff] }
 0x1e1   : > { %v1116_v12 = vsel %vm1111_vm8, %v1113_v17, %v1115_v31  ;;  %1763 = vmatpush.bf16.msra.mxu2 %v2514_v29 }
 0x1e2   : > { %v1125_v34 = vadd.f32 %v1116_v12, %v3403_v13  ;;  %v1085_v35 = vpop.f32.mrf.mxu0  ;;  %v1181_v45 = vsel %vm1173_vm15, %v3474_v32, %v1177_v36  ;;  %1746 = vmatpush.bf16.msra.mxu1 %v2505_v25  ;;  %v2520_v12 = vld [vmem:[#allocation10 + $0x168] sm:$0xff]  ;;  %v2519_v36 = vld [vmem:[#allocation10 + $0x160] sm:$0xff] }
 0x1e3   : > { %v1086_v37 = vadd.f32 %v1085_v35, %v1067_v33  ;;  %v1185_v48 = vpack.c.bf16 %v1181_v45, %v1181_v45  ;;  %v2513_v33 = vld [vmem:[#allocation10 + $0x130] sm:$0xff]  ;;  %v2512_v35 = vld [vmem:[#allocation10 + $0x128] sm:$0xff] }
 0x1e4   : > { %v1161_v40 = vrot.slane %v1125_v34, 2  ;;  %1782 = vmatpush.bf16.msra.mxu3 %v2521_v30  ;;  %v2501_v34 = vld [vmem:[#allocation10 + $0xd0] sm:$0xff] }
 0x1e5   : > { %v1105_v42 = vadd.f32 %v1104_v41, %v1086_v37  ;;  %v1241_v54 = vunpack.c.l.b16 %v1185_v48  ;;  %1764 = vmatpush.bf16.msra.mxu2 %v2513_v33  ;;  %v2500_v37 = vld [vmem:[#allocation10 + $0xc8] sm:$0xff]  ;;  %v2518_v41 = vld [vmem:[#allocation10 + $0x158] sm:$0xff] }
 0x1e6   : > { %v1162_v44 = vsel %vm1157_vm11, %v1159_v27, %v1161_v40  ;;  %v2504_v27 = vld [vmem:[#allocation10 + $0xe8] sm:$0xff] }
 0x1e7   : > { %v1117_v46 = vrot.slane %v1105_v42, 6  ;;  %v3485_v13 = vsel %vm1142_vm0, %v1162_v44, 0.0  ;;  %1747 = vmatpush.bf16.msra.mxu1 %v2504_v27  ;;  %v2499_v42 = vld [vmem:[#allocation10 + $0xc0] sm:$0xff]  ;;  %v2517_v44 = vld [vmem:[#allocation10 + $0x150] sm:$0xff]  ;;  %v2516_v48 = vld [vmem:[#allocation10 + $0x148] sm:$0xff] }
 0x1e8   : > { %vm1174_vm3 = vcmp.ge.f32.partialorder %v3485_v13, 0.0  ;;  %v1178_v47 = vmul.f32 0.1, %v3485_v13  ;;  %1783 = vmatpush.bf16.msra.mxu3 %v2520_v12 }
 0x1e9   : > { %v1118_v53 = vsel %vm1111_vm8, %v1115_v31, %v1117_v46  ;;  %v2502_v31 = vld [vmem:[#allocation10 + $0xd8] sm:$0xff]  ;;  %1765 = vmatpush.bf16.msra.mxu2 %v2512_v35  ;;  %v2509_v46 = vld [vmem:[#allocation10 + $0x110] sm:$0xff] }
 0x1ea   : > { %v1126_v49 = vadd.f32 %v1118_v53, %v3411_v16  ;;  %v1182_v50 = vsel %vm1174_vm3, %v3485_v13, %v1178_v47  ;;  %v1481_v47 = vstv %s1480_s20  ;;  %s1831_s20 = scalar_lea.hbm %s3685_s0, %s2414_s27 }
 0x1eb   : > { %v1186_v51 = vpack.c.bf16 %v1182_v50, %v1182_v50  ;;  %1748 = vmatpush.bf16.msra.mxu1 %v2503_v11  ;;  %v1482_v50 = vadd.s32 %v1481_v47, %v3427_v10  ;;  %s1834_s15 = sshll.u32 %s1831_s20, 4  ;;  %s1835_s15 = int_to_ptr.hbm [resolvable:$true] %s1834_s15 }
 0x1ec   : > { %v1163_v52 = vrot.slane %v1126_v49, 2  ;;  %1784 = vmatpush.bf16.msra.mxu3 %v2519_v36  ;;  %v2713_v49 = vld [vmem:[%s3682_s23 + $0x1] ss:$0 sm:$0xff]  ;;  %s2879_s8 = sshra.s32 %s1835_s15, 4  ;;  %s2880_s8 = int_to_ptr.hbm [resolvable:$true] %s2879_s8 }
 0x1ed   : > { %v1242_v55 = vunpack.c.l.b16 %v1186_v51  ;;  %1766 = vmatpush.bf16.msra.mxu2 %v2511_v39  ;;  %v2508_v51 = vld [vmem:[#allocation10 + $0x108] sm:$0xff]  ;;  %vm1485_vm14 = vcmp.ge.s32.totalorder %v1482_v50, 0  ;;  %vm1488_vm15 = vcmp.lt.s32.totalorder %v1482_v50, 50  ;;  %s2881_s1 = scalar_lea.hbm %s2880_s8, 16  ;;  %p2886_p1 = scmp.lt.s32.totalorder %s2880_s8, %s3685_s0 }
 0x1ee   : > { %v1164_v56 = vsel %vm1157_vm11, %v1161_v40, %v1163_v52  ;;  %v1172_v57 = vsel %vm1144_vm9, %v1163_v52, 0.0  ;;  %vm1271_vm11 = vcmask 1044480   ;;  %v2515_v52 = vld [vmem:[#allocation10 + $0x140] sm:$0xff]  ;;  %vm1491_vm0 = vmand %vm1485_vm14, %vm1488_vm15  ;;  %p2882_p10 = scmp.ne.s32.totalorder %s2880_s8, %s2881_s1  ;;  %p2887_p2 = scmp.lt.s32.totalorder %s2885_s7, %s2881_s1 }
 0x1ef   : > { %v3493_v58 = vsel %vm1143_vm10, %v1164_v56, 0.0  ;;  %vm1176_vm12 = vcmp.ge.f32.partialorder %v1172_v57, 0.0  ;;  %v1180_v59 = vmul.f32 0.1, %v1172_v57  ;;  %v1244_v60 = vpack.c.b16 %v1242_v55, %v1241_v54  ;;  %1749 = vmatpush.bf16.msra.mxu1 %v2502_v31  ;;  %v2507_v54 = vld [vmem:[#allocation10 + $0x100] sm:$0xff] }
 0x1f0   : > { %v1179_v61 = vmul.f32 0.1, %v3493_v58  ;;  %vm1175_vm8 = vcmp.ge.f32.partialorder %v3493_v58, 0.0  ;;  %1785 = vmatpush.bf16.msra.mxu3 %v2518_v41  ;;  %p2883_p12 = pnand %p2882_p10, %p3320_p11  ;;  %p2888_p3 = por %p2887_p2, %p2886_p1 }
 0x1f1   : > { %v1184_v16 = vsel %vm1176_vm12, %v1172_v57, %v1180_v59  ;;  %1434 = vmatmul.bf16.vlgmr.msrb.gmra.mxu2 %v1244_v60  ;;  %v1253_v2 = vshrl.u32 %v1244_v60, 16  ;;  %v1256_v4 = vshll.u32 %v1244_v60, 16  ;;  %v1272_v6 = vrot.slane %v1244_v60, 3 }
 0x1f2   : > { %v1188_v62 = vpack.c.bf16 %v1184_v16, %v1184_v16  ;;  %v1183_v63 = vsel %vm1175_vm8, %v3493_v58, %v1179_v61  ;;  %1767 = vmatpush.bf16.msra.mxu2 %v2510_v43  ;;  %v1483_v16 = vadd.s32 %v1481_v47, %v3440_v26  ;;  %p2884_p9 = pneg %p2883_p12 }
 0x1f3   : > { %v1187_v0 = vpack.c.bf16 %v1183_v63, %v1183_v63  ;;  %v1255_v7 = vrot.slane %v1253_v2, 1  ;;  %v1258_v9 = vrot.slane %v1256_v4, 2  ;;  %1750 = vmatpush.bf16.msra.mxu1 %v2501_v34 }
 0x1f4   : > { %v1249_v1 = vunpack.c.l.b16 %v1188_v62  ;;  %1786 = vmatpush.bf16.msra.mxu3 %v2517_v44  ;;  %vm1486_vm1 = vcmp.ge.s32.totalorder %v1483_v16, 0  ;;  %vm1489_vm2 = vcmp.lt.s32.totalorder %v1483_v16, 50  ;;  %p2889_p5 = pnand %p2888_p3, %p2884_p9 }
 0x1f5   : > { %v1243_v3 = vunpack.c.l.b16 %v1187_v0  ;;  %v1259_v20 = vor.u32 %v1258_v9, %v1255_v7  ;;  %vm1492_vm6 = vmand %vm1486_vm1, %vm1489_vm2 }
 0x1f6   : > { %1768 = vmatpush.bf16.msra.mxu2 %v2509_v46 }
 0x1f7   : > { %v1250_v5 = vpack.c.b16 %v1249_v1, %v1243_v3  ;;  %v1245_v23 = vpack.c.b16 %v1243_v3, %v1243_v3  ;;  %1751 = vmatpush.bf16.msra.mxu1 %v2500_v37 }
 0x1f8   : > { %1787 = vmatpush.bf16.msra.mxu3 %v2516_v48 }
 0x1f9   : > { %v1273_v8 = vrot.slane %v1250_v5, 3  ;;  %v1261_v14 = vshrl.u32 %v1250_v5, 16  ;;  %v1264_v17 = vshll.u32 %v1250_v5, 16  ;;  %v1484_v5 = vadd.s32 %v1481_v47, %v3446_v38 }
 0x1fa   : > { %1769 = vmatpush.bf16.msra.mxu2 %v2508_v51 }
 0x1fb   : > { %v1274_v18 = vsel %vm1271_vm11, %v1272_v6, %v1273_v8  ;;  %v1263_v15 = vrot.slane %v1261_v14, 1  ;;  %v1266_v19 = vrot.slane %v1264_v17, 2  ;;  %1752 = vmatpush.bf16.msra.mxu1 %v2499_v42  ;;  %vm1487_vm9 = vcmp.ge.s32.totalorder %v1484_v5, 0 }
 0x1fc   : > { %1470 = vmatmul.bf16.vlgmr.msra.gmra.mxu0 %v1274_v18  ;;  %1788 = vmatpush.bf16.msra.mxu3 %v2515_v52  ;;  %vm1490_vm10 = vcmp.lt.s32.totalorder %v1484_v5, 50 }
 0x1fd   : > { %v1267_v21 = vor.u32 %v1266_v19, %v1263_v15  ;;  %vm1493_vm12 = vmand %vm1487_vm9, %vm1490_vm10 }
 0x1fe   : > { %1770 = vmatpush.bf16.msra.mxu2 %v2507_v54 }
 0x1ff   : > { %v1268_v22 = vsel %vm1251_vm13, %v1259_v20, %v1267_v21 }
 0x200   : > { %1452 = vmatmul.bf16.vlgmr.msrb.gmra.mxu3 %v1268_v22 }
 0x201   : > { %1439 = vmatmul.bf16.gmra.mxu2 %v1245_v23 }
 0x20c   : > { %1475 = vmatmul.bf16.gmra.mxu0 %v1273_v8 }
 0x210   : > { %1457 = vmatmul.bf16.gmra.mxu3 %v1267_v21 }
 0x274   : > { %v1435_v40 = vpop.f32.mrf.mxu2 }
 0x275   : > { %v1436_v56 = vadd.f32 %v2713_v49, %v1435_v40 }
 0x279   : > { %v1471_v45 = vpop.f32.mrf.mxu0 }
 0x27c   : > { %v1437_v53 = vpop.f32.mrf.mxu2 }
 0x27d   : > { %v1438_v63 = vadd.f32 %v2713_v49, %v1437_v53 }
 0x281   : > { %v1473_v55 = vpop.f32.mrf.mxu0 }
 0x283   : > { %v1453_v57 = vpop.f32.mrf.mxu3 }
 0x284   : > { %v1454_v59 = vadd.f32 %v1453_v57, %v1436_v56  ;;  %v1440_v60 = vpop.f32.mrf.mxu2 }
 0x285   : > { %v1441_v14 = vadd.f32 %v2713_v49, %v1440_v60 }
 0x286   : > { %v1472_v61 = vadd.f32 %v1471_v45, %v1454_v59  ;;  %v2714_v45 = vld [vmem:[%s3683_s6 + $0x1] ss:$0 sm:$0xff] }
 0x288   : > { %v1500_v62 = vsel %vm1491_vm0, %v1472_v61, 0.0 }
 0x289   : > { %v1476_v10 = vpop.f32.mrf.mxu0  ;;  %v1506_v0 = vmul.f32 0.1, %v1500_v62  ;;  %vm1503_vm3 = vcmp.ge.f32.partialorder %v1500_v62, 0.0 }
 0x28b   : > { %v1455_v1 = vpop.f32.mrf.mxu3  ;;  %v1509_v6 = vsel %vm1503_vm3, %v1500_v62, %v1506_v0 }
 0x28c   : > { %v1456_v2 = vadd.f32 %v1455_v1, %v1438_v63  ;;  %v1442_v3 = vpop.f32.mrf.mxu2  ;;  %v1512_v26 = vpack.c.bf16 %v1509_v6, %v1509_v6 }
 0x28e   : > { %v1474_v4 = vadd.f32 %v1473_v55, %v1456_v2  ;;  %v1567_v20 = vunpack.c.l.b16 %v1512_v26 }
 0x290   : > { %v1501_v7 = vsel %vm1492_vm6, %v1474_v4, 0.0 }
 0x291   : > { %vm1504_vm7 = vcmp.ge.f32.partialorder %v1501_v7, 0.0  ;;  %v1507_v8 = vmul.f32 0.1, %v1501_v7  ;;  %v1478_v9 = vpop.f32.mrf.mxu0 }
 0x293   : > { %v1510_v17 = vsel %vm1504_vm7, %v1501_v7, %v1507_v8  ;;  %v1458_v18 = vpop.f32.mrf.mxu3 }
 0x294   : > { %v1513_v15 = vpack.c.bf16 %v1510_v17, %v1510_v17  ;;  %v1459_v19 = vadd.f32 %v1458_v18, %v1441_v14 }
 0x296   : > { %v1568_v21 = vunpack.c.l.b16 %v1513_v15  ;;  %v1477_v22 = vadd.f32 %v1476_v10, %v1459_v19 }
 0x298   : > { %v1502_v23 = vsel %vm1493_vm12, %v1477_v22, 0.0  ;;  %v1570_v24 = vpack.c.b16 %v1568_v21, %v1567_v20 }
 0x299   : > { %vm1505_vm8 = vcmp.ge.f32.partialorder %v1502_v23, 0.0  ;;  %v1508_v38 = vmul.f32 0.1, %v1502_v23 }
 0x29a   : > { %1753 = vmatmul.bf16.vlgmr.msra.gmra.mxu1 %v1570_v24  ;;  %v1577_v11 = vshll.u32 %v1570_v24, 16  ;;  %v1591_v33 = vrot.slane %v1570_v24, 1  ;;  %v1575_v34 = vshrl.u32 %v1570_v24, 16 }
 0x29b   : > { %v1511_v25 = vsel %vm1505_vm8, %v1502_v23, %v1508_v38  ;;  %v1460_v27 = vpop.f32.mrf.mxu3 }
 0x29c   : > { %v1514_v28 = vpack.c.bf16 %v1511_v25, %v1511_v25  ;;  %v1579_v31 = vrot.slane %v1577_v11, 1 }
 0x29e   : > { %v1569_v29 = vunpack.c.l.b16 %v1514_v28  ;;  %v1580_v37 = vor.u32 %v1579_v31, %v1575_v34 }
 0x2a0   : > { %v1571_v30 = vpack.c.b16 %v1569_v29, %v1569_v29 }
 0x2a2   : > { %v1592_v12 = vrot.slane %v1571_v30, 1  ;;  %v1582_v35 = vshll.u32 %v1571_v30, 16  ;;  %v1586_v41 = vshrl.u32 %v1571_v30, 16 }
 0x2a4   : > { %v1593_v36 = vsel %vm557_vm5, %v1591_v33, %v1592_v12  ;;  %v1584_v39 = vrot.slane %v1582_v35, 1 }
 0x2a5   : > { %1789 = vmatmul.bf16.vlgmr.msra.gmra.mxu3 %v1593_v36 }
 0x2a6   : > { %v1585_v40 = vsel %vm539_vm4, %v1580_v37, %v1584_v39  ;;  %v1588_v42 = vor.u32 %v1586_v41, %v1584_v39  ;;  %vm1802_vm4 = vcmask 1043456  }
 0x2a7   : > { %1771 = vmatmul.bf16.vlgmr.msra.gmra.mxu2 %v1585_v40 }
 0x2aa   : > { %1758 = vmatmul.bf16.gmra.mxu1 %v1571_v30 }
 0x2b5   : > { %1794 = vmatmul.bf16.gmra.mxu3 %v1592_v12 }
 0x2b7   : > { %1776 = vmatmul.bf16.gmra.mxu2 %v1588_v42 }
 0x317   : > { %v1754_v43 = vpop.f32.mrf.mxu1 }
 0x318   : > { %v1755_v53 = vadd.f32 %v2714_v45, %v1754_v43 }
 0x31f   : > { %v1756_v44 = vpop.f32.mrf.mxu1 }
 0x320   : > { %v1757_v55 = vadd.f32 %v2714_v45, %v1756_v44 }
 0x327   : > { %v1759_v46 = vpop.f32.mrf.mxu1 }
 0x328   : > { %v1790_v47 = vpop.f32.mrf.mxu3  ;;  %v1760_v62 = vadd.f32 %v2714_v45, %v1759_v46 }
 0x32a   : > { %v1772_v48 = vpop.f32.mrf.mxu2 }
 0x32b   : > { %v1773_v49 = vadd.f32 %v1772_v48, %v1755_v53 }
 0x32d   : > { %v1791_v50 = vadd.f32 %v1790_v47, %v1773_v49 }
 0x32f   : > { %v1803_v51 = vrot.slane %v1791_v50, 4  ;;  %v1761_v52 = vpop.f32.mrf.mxu1 }
 0x330   : > { %v1792_v54 = vpop.f32.mrf.mxu3 }
 0x331   : > { %v1811_v56 = vadd.f32 %v1803_v51, %v3474_v32 }
 0x332   : > { %v1774_v57 = vpop.f32.mrf.mxu2 }
 0x333   : > { %1814 = vst [vmem:[%s450_s14 - $0x6] sm:$0xc0] %v1811_v56  ;;  %v1775_v59 = vadd.f32 %v1774_v57, %v1757_v55 }
 0x335   : > { %v1793_v60 = vadd.f32 %v1792_v54, %v1775_v59 }
 0x337   : > { %v1804_v61 = vrot.slane %v1793_v60, 4 }
 0x338   : > { %v1795_v16 = vpop.f32.mrf.mxu3 }
 0x339   : > { %v1805_v10 = vsel %vm1802_vm4, %v1803_v51, %v1804_v61 }
 0x33a   : > { %v1812_v63 = vadd.f32 %v1805_v10, %v3485_v13  ;;  %v1777_v0 = vpop.f32.mrf.mxu2 }
 0x33b   : > { %v1778_v32 = vadd.f32 %v1777_v0, %v1760_v62 }
 0x33c   : > { %1815 = vst [vmem:[%s450_s14 + $0x2] sm:$0xff] %v1812_v63 }
 0x33d   : > { %v1796_v1 = vadd.f32 %v1795_v16, %v1778_v32 }
 0x33f   : > { %v1806_v2 = vrot.slane %v1796_v1, 4 }
 0x340   : > { %v1797_v3 = vpop.f32.mrf.mxu3 }
 0x341   : > { %v1807_v4 = vsel %vm1802_vm4, %v1804_v61, %v1806_v2 }
 0x342   : > { %v1813_v13 = vadd.f32 %v1807_v4, %v3493_v58  ;;  %v1779_v5 = vpop.f32.mrf.mxu2 }
 0x344   : > { %1816 = vst [vmem:[%s450_s14 + $0xa] sm:$0x3f] %v1813_v13 }
 0x345   : > { %2892 = shalt.err (!%p2889_p5)
}
 0x346   : > { %s3055_s13 = smov 128   ;;  %s3056_s14 = smov 8  }
 0x347   : > { %2538 = dma.vmem_to_hbm [thread:$0]  (%p3320_p11), %s1833_s5, 256, %s1835_s15, %s1818_s16, %s3055_s13, %s3055_s13, %s3056_s14  }
 0x348 PF: > { %p2566_p8 = scmp.ge.s32.totalorder %s3047_s17, 2  ;;  %s1849_s10 = sand.u32 1, %s2983_s24  }
 0x349   : > { %s1850_s18 = scalar_lea.sflag [#allocation4], %s1849_s10 }
 0x34a   : > { %p2558_p6 = pnand %p2566_p8, %p3324_p13 }
 0x34c   : > { %p2559_p0 = pneg %p2558_p6 }
 0x34e   : > { %2978 = dma.done.wait (%p2559_p0), %s1850_s18, 256  }
 0x34f   : > { %2980 = vsyncadd (%p2559_p0), %s1850_s18, 4294967040  ;;  %s27_s17 = sadd.s32 1, %s3047_s17   ;;  %s3687_s30 = sld [smem:[#allocation18_spill]] }
 0x350   : > { %p3540_p4 = scmp.ge.s32.totalorder %s27_s17, 10   ;;  %s3688_s10 = sld [smem:[#allocation19_spill]] }
 0x351   : > { %s3689_s4 = sld [smem:[#allocation31_spill]]  ;;  %s3694_s24 = smov %s2987_s25 }
 0x352   : > { %s3690_s13 = sld [smem:[#allocation22_spill]]  ;;  %s3695_s25 = smov %s2991_s26 }
 0x353   : > { %s3691_s14 = sld [smem:[#allocation23_spill]]  ;;  %s3696_s26 = smov %s3316_s21 }
 0x354   : > { %s3692_s15 = sld [smem:[#allocation28_spill]]  ;;  %s3697_s27 = smov %s2999_s28 }
 0x355   : > { %s3693_s16 = sld [smem:[#allocation29_spill]]  ;;  %s3698_s28 = smov %s3003_s29 }
 0x356   : > { %s3699_s29 = smov %s3343_s22  ;;  %s3700_s8 = smov %s3015_s9 }
 0x357   : > { %s3701_s9 = smov %s3298_s3  ;;  %s3702_s11 = smov %s3027_s12 }
 0x358   : > { %s3703_s12 = smov %s3689_s4  ;;  %26 = sbr.rel (!%p3540_p4) target bundleno = 24 (0x18), region = 129 }
 0x35d   :  { %1856 = vsyncpa [#allocation3], 1 }
 0x35e   :  { %1858 = vsyncpa [#allocation3 + $0x1], 1 }
 0x35f   :  { %1859 = vsyncpa [#allocation6], 1 }
 0x360   :  { %1861 = vsyncpa [#allocation6 + $0x1], 1 }
 0x361   :  { %1862 = vsyncpa [#allocation9], 1 }
 0x362   :  { %1863 = vsyncpa [#allocation4], 1 }
 0x363   :  { %1865 = vsyncpa [#allocation4 + $0x1], 1 }

</bundles_post_ra>
